<compile_context>
chip_gen: v7x
topology: tpu7x:2x2x1
jax: 0.10.0
libtpu: 0.0.40
codegen_flags: <defaults>
</compile_context>

<pallas_src>
import jax
import jax.numpy as jnp
from jax import lax
from jax.experimental import pallas as pl
from jax.experimental.pallas import tpu as pltpu


# ----------------------------------------------------------------------------
# small helpers
# ----------------------------------------------------------------------------
def _round_up(x, m):
    return (x + m - 1) // m * m


def _pick_time_block(T, pref=16):
    tb = min(pref, T)
    while T % tb:
        tb -= 1
    return tb


def _pad_gate_weight(w, n_gates, h, hp):
    """PyTorch (n_gates*h, f_in) -> transposed (f_in, n_gates*hp).

    Each gate gets its own hp-wide, 128-aligned column slab (zero padded), so
    gate slices inside the kernel are lane-aligned static views."""
    f_in = w.shape[1]
    w = w.reshape(n_gates, h, f_in).astype(jnp.float32)
    wp = jnp.zeros((n_gates, hp, f_in), jnp.float32).at[:, :h, :].set(w)
    return jnp.transpose(wp, (2, 0, 1)).reshape(f_in, n_gates * hp)


def _pad_hh_weight(w, n_gates, h, hp):
    """(n_gates*h, h) -> (hp, n_gates*hp); padded hidden rows are zero so the
    padded hidden lanes can never contaminate real gate columns."""
    wt = _pad_gate_weight(w, n_gates, h, hp)                 # (h, n_gates*hp)
    return jnp.zeros((hp, n_gates * hp), jnp.float32).at[:h, :].set(wt)


def _pad_gate_bias(b, n_gates, h, hp):
    b = b.reshape(n_gates, h).astype(jnp.float32)
    bp = jnp.zeros((n_gates, hp), jnp.float32).at[:, :h].set(b)
    return bp.reshape(n_gates * hp)


# ----------------------------------------------------------------------------
# row-tiled matmul+bias (used by the Linear candidate)
# ----------------------------------------------------------------------------
def _matmul_bias_kernel(x_ref, w_ref, b_ref, o_ref):
    o_ref[...] = (jnp.dot(x_ref[...], w_ref[...],
                          preferred_element_type=jnp.float32)
                  + b_ref[...]).astype(o_ref.dtype)


def matmul_bias_pallas(x2d, w, b, out_dtype, block_m=256):
    """y = x2d @ w + b, tiled over rows with a 'parallel' grid axis."""
    M, K = x2d.shape
    N = w.shape[1]
    bm = min(block_m, _round_up(M, 8))
    Mp = _round_up(M, bm)
    if Mp != M:
        x2d = jnp.pad(x2d, ((0, Mp - M), (0, 0)))
    y = pl.pallas_call(
        _matmul_bias_kernel,
        out_shape=jax.ShapeDtypeStruct((Mp, N), out_dtype),
        grid=(Mp // bm,),
        in_specs=[
            pl.BlockSpec((bm, K), lambda m: (m, 0)),
            pl.BlockSpec((K, N), lambda m: (0, 0)),
            pl.BlockSpec((1, N), lambda m: (0, 0)),
        ],
        out_specs=pl.BlockSpec((bm, N), lambda m: (m, 0)),
        compiler_params=pltpu.CompilerParams(
            dimension_semantics=("parallel",)),
    )(x2d, w, b[None, :].astype(jnp.float32))
    return y[:M]


# ----------------------------------------------------------------------------
# LSTM candidate (nn.LSTM(in_dim, dim, batch_first=True), single layer)
# PyTorch gate order: i, f, g, o.
# Fused design: per time block, gi = x @ W_ih + (b_ih + b_hh) is one large MXU
# matmul into VMEM scratch; the serial loop only does h @ W_hh + gate math.
# ----------------------------------------------------------------------------
def _lstm_kernel(x_ref, wih_ref, bias_ref, whh_ref, y_ref, cN_ref,
                 gi_sc, h_sc, c_sc):
    tb = pl.program_id(0)

    @pl.when(tb == 0)
    def _():
        h_sc[...] = jnp.zeros_like(h_sc)
        c_sc[...] = jnp.zeros_like(c_sc)

    bp, hp = h_sc.shape
    n_steps = gi_sc.shape[0] // bp

    # Hoisted (per-block) input projection: one big matmul for TB timesteps.
    gi_sc[...] = (jnp.dot(x_ref[...], wih_ref[...],
                          preferred_element_type=jnp.float32)
                  + bias_ref[...])

    def step(t, carry):
        off = pl.multiple_of(t * bp, 8)
        gates = gi_sc[pl.ds(off, bp), :] + jnp.dot(
            h_sc[...], whh_ref[...], preferred_element_type=jnp.float32)
        i_g = jax.nn.sigmoid(gates[:, 0 * hp:1 * hp])
        f_g = jax.nn.sigmoid(gates[:, 1 * hp:2 * hp])
        g_g = jnp.tanh(gates[:, 2 * hp:3 * hp])
        o_g = jax.nn.sigmoid(gates[:, 3 * hp:4 * hp])
        c = f_g * c_sc[...] + i_g * g_g
        h = o_g * jnp.tanh(c)
        c_sc[...] = c
        h_sc[...] = h
        y_ref[pl.ds(off, bp), :] = h.astype(y_ref.dtype)
        return carry

    lax.fori_loop(0, n_steps, step, 0, unroll=True)

    @pl.when(tb == pl.num_programs(0) - 1)
    def _():
        cN_ref[...] = c_sc[...].astype(cN_ref.dtype)


def lstm_pallas(x, params, time_block=16):
    """x: (B, T, in_dim) -> (y (B,T,H), (h_n (1,B,H), c_n (1,B,H)))."""
    B, T, Din = x.shape
    H = params["w_hh"].shape[1]                       # w_hh: (4H, H)
    Hp = _round_up(H, 128)
    Bp = _round_up(B, 8)

    w_ih = _pad_gate_weight(params["w_ih"], 4, H, Hp)           # (Din, 4Hp)
    w_hh = _pad_hh_weight(params["w_hh"], 4, H, Hp)             # (Hp, 4Hp)
    bias = _pad_gate_bias(params["b_ih"] + params["b_hh"], 4, H, Hp)

    xp = jnp.pad(x, ((0, Bp - B), (0, 0), (0, 0)))              # (Bp,T,Din)
    x_tm = jnp.transpose(xp, (1, 0, 2)).reshape(T * Bp, Din)    # (T*Bp,Din)

    TB = _pick_time_block(T, time_block)
    y_flat, c_last = pl.pallas_call(
        _lstm_kernel,
        out_shape=(jax.ShapeDtypeStruct((T * Bp, Hp), x.dtype),
                   jax.ShapeDtypeStruct((Bp, Hp), x.dtype)),
        grid=(T // TB,),
        in_specs=[
            pl.BlockSpec((TB * Bp, Din), lambda tb: (tb, 0)),
            pl.BlockSpec((Din, 4 * Hp), lambda tb: (0, 0)),
            pl.BlockSpec((1, 4 * Hp), lambda tb: (0, 0)),
            pl.BlockSpec((Hp, 4 * Hp), lambda tb: (0, 0)),
        ],
        out_specs=(
            pl.BlockSpec((TB * Bp, Hp), lambda tb: (tb, 0)),
            pl.BlockSpec((Bp, Hp), lambda tb: (0, 0)),
        ),
        scratch_shapes=[pltpu.VMEM((TB * Bp, 4 * Hp), jnp.float32),
                        pltpu.VMEM((Bp, Hp), jnp.float32),
                        pltpu.VMEM((Bp, Hp), jnp.float32)],
        compiler_params=pltpu.CompilerParams(
            dimension_semantics=("arbitrary",)),
    )(x_tm, w_ih, bias[None, :], w_hh)

    y = jnp.transpose(y_flat.reshape(T, Bp, Hp), (1, 0, 2))[:B, :, :H]
    h_n = y[:, -1, :][None]                                     # (1,B,H)
    c_n = c_last[:B, :H][None]                                  # (1,B,H)
    return (y, (h_n, c_n))


# ----------------------------------------------------------------------------
# GRU candidate (nn.GRU(in_dim, dim, batch_first=True), single layer)
# PyTorch gate order: r, z, n.  gi = x @ W_ih + b_ih is fused per time block;
# b_hh stays inside the recurrence because of the r * (W_hn h + b_hn) term.
# ----------------------------------------------------------------------------
def _gru_kernel(x_ref, wih_ref, bih_ref, whh_ref, bhh_ref, y_ref,
                gi_sc, h_sc):
    tb = pl.program_id(0)

    @pl.when(tb == 0)
    def _():
        h_sc[...] = jnp.zeros_like(h_sc)

    bp, hp = h_sc.shape
    n_steps = gi_sc.shape[0] // bp

    gi_sc[...] = (jnp.dot(x_ref[...], wih_ref[...],
                          preferred_element_type=jnp.float32)
                  + bih_ref[...])

    def step(t, carry):
        off = pl.multiple_of(t * bp, 8)
        gi = gi_sc[pl.ds(off, bp), :]                            # (Bp, 3Hp)
        gh = jnp.dot(h_sc[...], whh_ref[...],
                     preferred_element_type=jnp.float32) + bhh_ref[...]
        r = jax.nn.sigmoid(gi[:, 0 * hp:1 * hp] + gh[:, 0 * hp:1 * hp])
        z = jax.nn.sigmoid(gi[:, 1 * hp:2 * hp] + gh[:, 1 * hp:2 * hp])
        n = jnp.tanh(gi[:, 2 * hp:3 * hp] + r * gh[:, 2 * hp:3 * hp])
        h = (1.0 - z) * n + z * h_sc[...]
        h_sc[...] = h
        y_ref[pl.ds(off, bp), :] = h.astype(y_ref.dtype)
        return carry

    lax.fori_loop(0, n_steps, step, 0, unroll=True)


def gru_pallas(x, params, time_block=16):
    """x: (B, T, in_dim) -> (y (B,T,H), h_n (1,B,H))."""
    B, T, Din = x.shape
    H = params["w_hh"].shape[1]                       # w_hh: (3H, H)
    Hp = _round_up(H, 128)
    Bp = _round_up(B, 8)

    w_ih = _pad_gate_weight(params["w_ih"], 3, H, Hp)           # (Din, 3Hp)
    w_hh = _pad_hh_weight(params["w_hh"], 3, H, Hp)             # (Hp, 3Hp)
    b_ih = _pad_gate_bias(params["b_ih"], 3, H, Hp)
    b_hh = _pad_gate_bias(params["b_hh"], 3, H, Hp)

    xp = jnp.pad(x, ((0, Bp - B), (0, 0), (0, 0)))
    x_tm = jnp.transpose(xp, (1, 0, 2)).reshape(T * Bp, Din)    # (T*Bp,Din)

    TB = _pick_time_block(T, time_block)
    y_flat = pl.pallas_call(
        _gru_kernel,
        out_shape=jax.ShapeDtypeStruct((T * Bp, Hp), x.dtype),
        grid=(T // TB,),
        in_specs=[
            pl.BlockSpec((TB * Bp, Din), lambda tb: (tb, 0)),
            pl.BlockSpec((Din, 3 * Hp), lambda tb: (0, 0)),
            pl.BlockSpec((1, 3 * Hp), lambda tb: (0, 0)),
            pl.BlockSpec((Hp, 3 * Hp), lambda tb: (0, 0)),
            pl.BlockSpec((1, 3 * Hp), lambda tb: (0, 0)),
        ],
        out_specs=pl.BlockSpec((TB * Bp, Hp), lambda tb: (tb, 0)),
        scratch_shapes=[pltpu.VMEM((TB * Bp, 3 * Hp), jnp.float32),
                        pltpu.VMEM((Bp, Hp), jnp.float32)],
        compiler_params=pltpu.CompilerParams(
            dimension_semantics=("arbitrary",)),
    )(x_tm, w_ih, b_ih[None, :], w_hh, b_hh[None, :])

    y = jnp.transpose(y_flat.reshape(T, Bp, Hp), (1, 0, 2))[:B, :, :H]
    h_n = y[:, -1, :][None]
    return (y, h_n)


# ----------------------------------------------------------------------------
# Linear candidate: y = x @ W^T + b over the last dim (lane-dense padded H)
# ----------------------------------------------------------------------------
def linear_pallas(x, params):
    B, T, Din = x.shape
    H = params["w"].shape[0]
    Hp = _round_up(H, 128)
    w = jnp.zeros((Din, Hp), jnp.float32).at[:, :H].set(
        params["w"].T.astype(jnp.float32))
    b = jnp.zeros((Hp,), jnp.float32).at[:H].set(
        params["b"].astype(jnp.float32))
    y2d = matmul_bias_pallas(x.reshape(B * T, Din), w, b, x.dtype)
    return y2d.reshape(B, T, Hp)[:, :, :H]


# ----------------------------------------------------------------------------
# Identity / Zero candidates
# ----------------------------------------------------------------------------
def identity_op(x):
    return x


def zero_op(x, output_size=None):
    if output_size is None:
        return jnp.zeros_like(x)
    return jnp.zeros(x.shape[:-1] + (output_size,), x.dtype)


# TODO(synk): LiGRU, QuasiRNN and the custom Conv wrapper are project-local
# modules whose definitions are not available; they are not implemented here.


# ----------------------------------------------------------------------------
# _GenericBlock: SelectOp dispatch.  forward(x) -> tuple, mirroring
#   res = self.op(x); return (res, None) if not isinstance(res, tuple) else res
# ----------------------------------------------------------------------------
CANDIDATES = ("lstm", "gru", "ligru", "quasirnn", "linear", "conv",
              "identity", "zero")


def init_generic_block_params(key, dim, in_dim=None, dtype=jnp.float32):
    if in_dim is None:
        in_dim = dim
    ks = jax.random.split(key, 10)
    s = 1.0 / jnp.sqrt(dim)
    u = lambda k, shape: jax.random.uniform(k, shape, dtype, -s, s)
    return {
        "lstm": {"w_ih": u(ks[0], (4 * dim, in_dim)),
                 "w_hh": u(ks[1], (4 * dim, dim)),
                 "b_ih": u(ks[2], (4 * dim,)),
                 "b_hh": u(ks[3], (4 * dim,))},
        "gru": {"w_ih": u(ks[4], (3 * dim, in_dim)),
                "w_hh": u(ks[5], (3 * dim, dim)),
                "b_ih": u(ks[6], (3 * dim,)),
                "b_hh": u(ks[7], (3 * dim,))},
        "linear": {"w": u(ks[8], (dim, in_dim)),
                   "b": u(ks[9], (dim,))},
    }


def generic_block_forward(x, params, select="lstm", is_reduction=False,
                          dim=None):
    if select == "lstm":
        res = lstm_pallas(x, params["lstm"])
    elif select == "gru":
        res = gru_pallas(x, params["gru"])
    elif select == "linear":
        res = linear_pallas(x, params["linear"])
    elif select == "identity":
        res = identity_op(x)
    elif select == "zero":
        res = zero_op(x, output_size=dim if is_reduction else None)
    else:
        raise NotImplementedError(f"candidate '{select}' not implemented")
    if not isinstance(res, tuple):
        return (res, None)
    return res


# ----------------------------------------------------------------------------
# pure-JAX references (sanity check only)
# ----------------------------------------------------------------------------
def _lstm_ref(x, p):
    H = p["w_hh"].shape[1]
    B = x.shape[0]

    def step(carry, x_t):
        h, c = carry
        g = x_t @ p["w_ih"].T + p["b_ih"] + h @ p["w_hh"].T + p["b_hh"]
        i = jax.nn.sigmoid(g[:, :H])
        f = jax.nn.sigmoid(g[:, H:2 * H])
        gg = jnp.tanh(g[:, 2 * H:3 * H])
        o = jax.nn.sigmoid(g[:, 3 * H:])
        c = f * c + i * gg
        h = o * jnp.tanh(c)
        return (h, c), h

    init = (jnp.zeros((B, H), jnp.float32), jnp.zeros((B, H), jnp.float32))
    (h, c), ys = lax.scan(step, init, jnp.transpose(x, (1, 0, 2)))
    return jnp.transpose(ys, (1, 0, 2)), h[None], c[None]


def _gru_ref(x, p):
    H = p["w_hh"].shape[1]
    B = x.shape[0]

    def step(h, x_t):
        gi = x_t @ p["w_ih"].T + p["b_ih"]
        gh = h @ p["w_hh"].T + p["b_hh"]
        r = jax.nn.sigmoid(gi[:, :H] + gh[:, :H])
        z = jax.nn.sigmoid(gi[:, H:2 * H] + gh[:, H:2 * H])
        n = jnp.tanh(gi[:, 2 * H:] + r * gh[:, 2 * H:])
        h = (1.0 - z) * n + z * h
        return h, h

    h, ys = lax.scan(step, jnp.zeros((B, H), jnp.float32),
                     jnp.transpose(x, (1, 0, 2)))
    return jnp.transpose(ys, (1, 0, 2)), h[None]


if __name__ == "__main__":
    B, T, DIM = 2, 8, 32
    key = jax.random.PRNGKey(0)
    kx, kp = jax.random.split(key)
    x = jax.random.normal(kx, (B, T, DIM), jnp.float32)
    params = init_generic_block_params(kp, DIM)

    # Selected path (LSTM) — the fused recurrent Pallas kernel.
    y, (h_n, c_n) = generic_block_forward(x, params, select="lstm")
    jax.block_until_ready((y, h_n, c_n))
    assert y.shape == (B, T, DIM), y.shape
    assert h_n.shape == (1, B, DIM) and c_n.shape == (1, B, DIM)

    # Exercise other candidates.
    y_gru, h_gru = generic_block_forward(x, params, select="gru")
    y_lin, _ = generic_block_forward(x, params, select="linear")
    y_id, _ = generic_block_forward(x, params, select="identity")
    y_zero, _ = generic_block_forward(x, params, select="zero")
    jax.block_until_ready((y_gru, h_gru, y_lin, y_id, y_zero))
    assert y_gru.shape == (B, T, DIM) and h_gru.shape == (1, B, DIM)
    assert y_lin.shape == (B, T, DIM)
    assert y_id.shape == x.shape and y_zero.shape == x.shape

    # Loose numerical sanity checks vs pure-JAX references (MXU precision).
    yr, hr, cr = _lstm_ref(x, params["lstm"])
    assert jnp.allclose(y, yr, atol=5e-2, rtol=5e-2)
    assert jnp.allclose(h_n, hr, atol=5e-2, rtol=5e-2)
    assert jnp.allclose(c_n, cr, atol=5e-2, rtol=5e-2)
    ygr, hgr = _gru_ref(x, params["gru"])
    assert jnp.allclose(y_gru, ygr, atol=5e-2, rtol=5e-2)
    assert jnp.allclose(h_gru, hgr, atol=5e-2, rtol=5e-2)
    ylr = x @ params["linear"]["w"].T + params["linear"]["b"]
    assert jnp.allclose(y_lin, ylr, atol=5e-2, rtol=5e-2)

    print("KERNEL_OK")
</pallas_src>

<mosaic_0001>
module attributes {stable_mosaic.version = 11 : i64} {
  func.func @_lstm_kernel(%arg0: i32, %arg1: memref<64x32xf32, #tpu.memory_space<vmem>>, %arg2: memref<32x512xf32, #tpu.memory_space<vmem>>, %arg3: memref<1x512xf32, #tpu.memory_space<vmem>>, %arg4: memref<128x512xf32, #tpu.memory_space<vmem>>, %arg5: memref<64x128xf32, #tpu.memory_space<vmem>>, %arg6: memref<8x128xf32, #tpu.memory_space<vmem>>, %arg7: memref<64x512xf32, #tpu.memory_space<vmem>>, %arg8: memref<8x128xf32, #tpu.memory_space<vmem>>, %arg9: memref<8x128xf32, #tpu.memory_space<vmem>>) attributes {dimension_semantics = [#tpu.dimension_semantics<arbitrary>], iteration_bounds = array<i64: 1>, scalar_prefetch = 0 : i64, scratch_operands = 3 : i64, tpu.core_type = #tpu.core_type<tc>, window_params = [{transform_indices = @transform_0, window_bounds = array<i64: 64, 32>}, {pipeline_mode = #tpu.pipeline_mode<synchronous>, transform_indices = @transform_1, window_bounds = array<i64: 32, 512>}, {pipeline_mode = #tpu.pipeline_mode<synchronous>, transform_indices = @transform_2, window_bounds = array<i64: 1, 512>}, {pipeline_mode = #tpu.pipeline_mode<synchronous>, transform_indices = @transform_3, window_bounds = array<i64: 128, 512>}, {transform_indices = @transform_4, window_bounds = array<i64: 64, 128>}, {pipeline_mode = #tpu.pipeline_mode<synchronous>, transform_indices = @transform_5, window_bounds = array<i64: 8, 128>}]} {
    %c0_i32 = arith.constant 0 : i32
    %0 = arith.cmpi eq, %arg0, %c0_i32 : i32
    %1 = arith.extui %0 : i1 to i32
    %c0_i32_0 = arith.constant 0 : i32
    %2 = arith.cmpi ne, %1, %c0_i32_0 : i32
    scf.if %2 {
      %cst_147 = arith.constant 0.000000e+00 : f32
      %317 = vector.broadcast %cst_147 : f32 to vector<8x128xf32>
      %c0_148 = arith.constant 0 : index
      %c0_149 = arith.constant 0 : index
      %318 = vector.load %arg8[%c0_148, %c0_149] : memref<8x128xf32, #tpu.memory_space<vmem>>, vector<8x128xf32>
      tpu.vector_store %arg8[%c0_148, %c0_149], %317 {strides = array<i32>} : memref<8x128xf32, #tpu.memory_space<vmem>>, vector<8x128xf32>,
      %cst_150 = arith.constant 0.000000e+00 : f32
      %319 = vector.broadcast %cst_150 : f32 to vector<8x128xf32>
      %c0_151 = arith.constant 0 : index
      %c0_152 = arith.constant 0 : index
      %320 = vector.load %arg9[%c0_151, %c0_152] : memref<8x128xf32, #tpu.memory_space<vmem>>, vector<8x128xf32>
      tpu.vector_store %arg9[%c0_151, %c0_152], %319 {strides = array<i32>} : memref<8x128xf32, #tpu.memory_space<vmem>>, vector<8x128xf32>,
    } else {
    }
    %c0 = arith.constant 0 : index
    %c0_1 = arith.constant 0 : index
    %3 = vector.load %arg1[%c0, %c0_1] : memref<64x32xf32, #tpu.memory_space<vmem>>, vector<64x32xf32>
    %c0_2 = arith.constant 0 : index
    %c0_3 = arith.constant 0 : index
    %4 = vector.load %arg2[%c0_2, %c0_3] : memref<32x512xf32, #tpu.memory_space<vmem>>, vector<32x512xf32>
    %cst = arith.constant dense<0.000000e+00> : vector<64x512xf32>
    %5 = tpu.matmul %3, %4, %cst {dimension_numbers = #tpu.dot_dimension_numbers<[1], [0], [0], [1], [0, 0, 1, 1], [], []>} : vector<64x32xf32>, vector<32x512xf32>, vector<64x512xf32> -> vector<64x512xf32>
    %c0_4 = arith.constant 0 : index
    %c0_5 = arith.constant 0 : index
    %6 = vector.load %arg3[%c0_4, %c0_5] : memref<1x512xf32, #tpu.memory_space<vmem>>, vector<1x512xf32>
    %7 = vector.broadcast %6 : vector<1x512xf32> to vector<64x512xf32>
    %8 = arith.addf %5, %7 : vector<64x512xf32>
    %c0_6 = arith.constant 0 : index
    %c0_7 = arith.constant 0 : index
    %9 = vector.load %arg7[%c0_6, %c0_7] : memref<64x512xf32, #tpu.memory_space<vmem>>, vector<64x512xf32>
    tpu.vector_store %arg7[%c0_6, %c0_7], %8 {strides = array<i32>} : memref<64x512xf32, #tpu.memory_space<vmem>>, vector<64x512xf32>,
    %c0_i32_8 = arith.constant 0 : i32
    %c8_i32 = arith.constant 8 : i32
    %10 = arith.muli %c0_i32_8, %c8_i32 : i32
    %11 = tpu.assume_multiple %10, 8 : i32
    %12 = arith.index_cast %11 : i32 to index
    %c0_9 = arith.constant 0 : index
    %13 = vector.load %arg7[%12, %c0_9] : memref<64x512xf32, #tpu.memory_space<vmem>>, vector<8x512xf32>
    %c0_10 = arith.constant 0 : index
    %c0_11 = arith.constant 0 : index
    %14 = vector.load %arg8[%c0_10, %c0_11] : memref<8x128xf32, #tpu.memory_space<vmem>>, vector<8x128xf32>
    %c0_12 = arith.constant 0 : index
    %c0_13 = arith.constant 0 : index
    %15 = vector.load %arg4[%c0_12, %c0_13] : memref<128x512xf32, #tpu.memory_space<vmem>>, vector<128x512xf32>
    %cst_14 = arith.constant dense<0.000000e+00> : vector<8x512xf32>
    %16 = tpu.matmul %14, %15, %cst_14 {dimension_numbers = #tpu.dot_dimension_numbers<[1], [0], [0], [1], [0, 0, 1, 1], [], []>} : vector<8x128xf32>, vector<128x512xf32>, vector<8x512xf32> -> vector<8x512xf32>
    %17 = arith.addf %13, %16 : vector<8x512xf32>
    %18 = vector.extract_strided_slice %17 {offsets = [0, 0], sizes = [8, 128], strides = [1, 1]} : vector<8x512xf32> to vector<8x128xf32>
    %19 = arith.negf %18 : vector<8x128xf32>
    %20 = math.exp %19 : vector<8x128xf32>
    %cst_15 = arith.constant 1.000000e+00 : f32
    %21 = vector.broadcast %cst_15 : f32 to vector<8x128xf32>
    %22 = arith.addf %21, %20 : vector<8x128xf32>
    %23 = arith.divf %21, %22 : vector<8x128xf32>
    %24 = vector.extract_strided_slice %17 {offsets = [0, 128], sizes = [8, 128], strides = [1, 1]} : vector<8x512xf32> to vector<8x128xf32>
    %25 = arith.negf %24 : vector<8x128xf32>
    %26 = math.exp %25 : vector<8x128xf32>
    %cst_16 = arith.constant 1.000000e+00 : f32
    %27 = vector.broadcast %cst_16 : f32 to vector<8x128xf32>
    %28 = arith.addf %27, %26 : vector<8x128xf32>
    %29 = arith.divf %27, %28 : vector<8x128xf32>
    %30 = vector.extract_strided_slice %17 {offsets = [0, 256], sizes = [8, 128], strides = [1, 1]} : vector<8x512xf32> to vector<8x128xf32>
    %31 = math.tanh %30 : vector<8x128xf32>
    %32 = vector.extract_strided_slice %17 {offsets = [0, 384], sizes = [8, 128], strides = [1, 1]} : vector<8x512xf32> to vector<8x128xf32>
    %33 = arith.negf %32 : vector<8x128xf32>
    %34 = math.exp %33 : vector<8x128xf32>
    %cst_17 = arith.constant 1.000000e+00 : f32
    %35 = vector.broadcast %cst_17 : f32 to vector<8x128xf32>
    %36 = arith.addf %35, %34 : vector<8x128xf32>
    %37 = arith.divf %35, %36 : vector<8x128xf32>
    %c0_18 = arith.constant 0 : index
    %c0_19 = arith.constant 0 : index
    %38 = vector.load %arg9[%c0_18, %c0_19] : memref<8x128xf32, #tpu.memory_space<vmem>>, vector<8x128xf32>
    %39 = arith.mulf %29, %38 : vector<8x128xf32>
    %40 = arith.mulf %23, %31 : vector<8x128xf32>
    %41 = arith.addf %39, %40 : vector<8x128xf32>
    %42 = math.tanh %41 : vector<8x128xf32>
    %43 = arith.mulf %37, %42 : vector<8x128xf32>
    %c0_20 = arith.constant 0 : index
    %c0_21 = arith.constant 0 : index
    %44 = vector.load %arg9[%c0_20, %c0_21] : memref<8x128xf32, #tpu.memory_space<vmem>>, vector<8x128xf32>
    tpu.vector_store %arg9[%c0_20, %c0_21], %41 {strides = array<i32>} : memref<8x128xf32, #tpu.memory_space<vmem>>, vector<8x128xf32>,
    %c0_22 = arith.constant 0 : index
    %c0_23 = arith.constant 0 : index
    %45 = vector.load %arg8[%c0_22, %c0_23] : memref<8x128xf32, #tpu.memory_space<vmem>>, vector<8x128xf32>
    tpu.vector_store %arg8[%c0_22, %c0_23], %43 {strides = array<i32>} : memref<8x128xf32, #tpu.memory_space<vmem>>, vector<8x128xf32>,
    %46 = arith.index_cast %11 : i32 to index
    %c0_24 = arith.constant 0 : index
    %47 = vector.load %arg5[%46, %c0_24] : memref<64x128xf32, #tpu.memory_space<vmem>>, vector<8x128xf32>
    tpu.vector_store %arg5[%46, %c0_24], %43 {strides = array<i32>} : memref<64x128xf32, #tpu.memory_space<vmem>>, vector<8x128xf32>,
    %c1_i32 = arith.constant 1 : i32
    %c8_i32_25 = arith.constant 8 : i32
    %48 = arith.muli %c1_i32, %c8_i32_25 : i32
    %49 = tpu.assume_multiple %48, 8 : i32
    %50 = arith.index_cast %49 : i32 to index
    %c0_26 = arith.constant 0 : index
    %51 = vector.load %arg7[%50, %c0_26] : memref<64x512xf32, #tpu.memory_space<vmem>>, vector<8x512xf32>
    %c0_27 = arith.constant 0 : index
    %c0_28 = arith.constant 0 : index
    %52 = vector.load %arg8[%c0_27, %c0_28] : memref<8x128xf32, #tpu.memory_space<vmem>>, vector<8x128xf32>
    %c0_29 = arith.constant 0 : index
    %c0_30 = arith.constant 0 : index
    %53 = vector.load %arg4[%c0_29, %c0_30] : memref<128x512xf32, #tpu.memory_space<vmem>>, vector<128x512xf32>
    %cst_31 = arith.constant dense<0.000000e+00> : vector<8x512xf32>
    %54 = tpu.matmul %52, %53, %cst_31 {dimension_numbers = #tpu.dot_dimension_numbers<[1], [0], [0], [1], [0, 0, 1, 1], [], []>} : vector<8x128xf32>, vector<128x512xf32>, vector<8x512xf32> -> vector<8x512xf32>
    %55 = arith.addf %51, %54 : vector<8x512xf32>
    %56 = vector.extract_strided_slice %55 {offsets = [0, 0], sizes = [8, 128], strides = [1, 1]} : vector<8x512xf32> to vector<8x128xf32>
    %57 = arith.negf %56 : vector<8x128xf32>
    %58 = math.exp %57 : vector<8x128xf32>
    %cst_32 = arith.constant 1.000000e+00 : f32
    %59 = vector.broadcast %cst_32 : f32 to vector<8x128xf32>
    %60 = arith.addf %59, %58 : vector<8x128xf32>
    %61 = arith.divf %59, %60 : vector<8x128xf32>
    %62 = vector.extract_strided_slice %55 {offsets = [0, 128], sizes = [8, 128], strides = [1, 1]} : vector<8x512xf32> to vector<8x128xf32>
    %63 = arith.negf %62 : vector<8x128xf32>
    %64 = math.exp %63 : vector<8x128xf32>
    %cst_33 = arith.constant 1.000000e+00 : f32
    %65 = vector.broadcast %cst_33 : f32 to vector<8x128xf32>
    %66 = arith.addf %65, %64 : vector<8x128xf32>
    %67 = arith.divf %65, %66 : vector<8x128xf32>
    %68 = vector.extract_strided_slice %55 {offsets = [0, 256], sizes = [8, 128], strides = [1, 1]} : vector<8x512xf32> to vector<8x128xf32>
    %69 = math.tanh %68 : vector<8x128xf32>
    %70 = vector.extract_strided_slice %55 {offsets = [0, 384], sizes = [8, 128], strides = [1, 1]} : vector<8x512xf32> to vector<8x128xf32>
    %71 = arith.negf %70 : vector<8x128xf32>
    %72 = math.exp %71 : vector<8x128xf32>
    %cst_34 = arith.constant 1.000000e+00 : f32
    %73 = vector.broadcast %cst_34 : f32 to vector<8x128xf32>
    %74 = arith.addf %73, %72 : vector<8x128xf32>
    %75 = arith.divf %73, %74 : vector<8x128xf32>
    %c0_35 = arith.constant 0 : index
    %c0_36 = arith.constant 0 : index
    %76 = vector.load %arg9[%c0_35, %c0_36] : memref<8x128xf32, #tpu.memory_space<vmem>>, vector<8x128xf32>
    %77 = arith.mulf %67, %76 : vector<8x128xf32>
    %78 = arith.mulf %61, %69 : vector<8x128xf32>
    %79 = arith.addf %77, %78 : vector<8x128xf32>
    %80 = math.tanh %79 : vector<8x128xf32>
    %81 = arith.mulf %75, %80 : vector<8x128xf32>
    %c0_37 = arith.constant 0 : index
    %c0_38 = arith.constant 0 : index
    %82 = vector.load %arg9[%c0_37, %c0_38] : memref<8x128xf32, #tpu.memory_space<vmem>>, vector<8x128xf32>
    tpu.vector_store %arg9[%c0_37, %c0_38], %79 {strides = array<i32>} : memref<8x128xf32, #tpu.memory_space<vmem>>, vector<8x128xf32>,
    %c0_39 = arith.constant 0 : index
    %c0_40 = arith.constant 0 : index
    %83 = vector.load %arg8[%c0_39, %c0_40] : memref<8x128xf32, #tpu.memory_space<vmem>>, vector<8x128xf32>
    tpu.vector_store %arg8[%c0_39, %c0_40], %81 {strides = array<i32>} : memref<8x128xf32, #tpu.memory_space<vmem>>, vector<8x128xf32>,
    %84 = arith.index_cast %49 : i32 to index
    %c0_41 = arith.constant 0 : index
    %85 = vector.load %arg5[%84, %c0_41] : memref<64x128xf32, #tpu.memory_space<vmem>>, vector<8x128xf32>
    tpu.vector_store %arg5[%84, %c0_41], %81 {strides = array<i32>} : memref<64x128xf32, #tpu.memory_space<vmem>>, vector<8x128xf32>,
    %c2_i32 = arith.constant 2 : i32
    %c8_i32_42 = arith.constant 8 : i32
    %86 = arith.muli %c2_i32, %c8_i32_42 : i32
    %87 = tpu.assume_multiple %86, 8 : i32
    %88 = arith.index_cast %87 : i32 to index
    %c0_43 = arith.constant 0 : index
    %89 = vector.load %arg7[%88, %c0_43] : memref<64x512xf32, #tpu.memory_space<vmem>>, vector<8x512xf32>
    %c0_44 = arith.constant 0 : index
    %c0_45 = arith.constant 0 : index
    %90 = vector.load %arg8[%c0_44, %c0_45] : memref<8x128xf32, #tpu.memory_space<vmem>>, vector<8x128xf32>
    %c0_46 = arith.constant 0 : index
    %c0_47 = arith.constant 0 : index
    %91 = vector.load %arg4[%c0_46, %c0_47] : memref<128x512xf32, #tpu.memory_space<vmem>>, vector<128x512xf32>
    %cst_48 = arith.constant dense<0.000000e+00> : vector<8x512xf32>
    %92 = tpu.matmul %90, %91, %cst_48 {dimension_numbers = #tpu.dot_dimension_numbers<[1], [0], [0], [1], [0, 0, 1, 1], [], []>} : vector<8x128xf32>, vector<128x512xf32>, vector<8x512xf32> -> vector<8x512xf32>
    %93 = arith.addf %89, %92 : vector<8x512xf32>
    %94 = vector.extract_strided_slice %93 {offsets = [0, 0], sizes = [8, 128], strides = [1, 1]} : vector<8x512xf32> to vector<8x128xf32>
    %95 = arith.negf %94 : vector<8x128xf32>
    %96 = math.exp %95 : vector<8x128xf32>
    %cst_49 = arith.constant 1.000000e+00 : f32
    %97 = vector.broadcast %cst_49 : f32 to vector<8x128xf32>
    %98 = arith.addf %97, %96 : vector<8x128xf32>
    %99 = arith.divf %97, %98 : vector<8x128xf32>
    %100 = vector.extract_strided_slice %93 {offsets = [0, 128], sizes = [8, 128], strides = [1, 1]} : vector<8x512xf32> to vector<8x128xf32>
    %101 = arith.negf %100 : vector<8x128xf32>
    %102 = math.exp %101 : vector<8x128xf32>
    %cst_50 = arith.constant 1.000000e+00 : f32
    %103 = vector.broadcast %cst_50 : f32 to vector<8x128xf32>
    %104 = arith.addf %103, %102 : vector<8x128xf32>
    %105 = arith.divf %103, %104 : vector<8x128xf32>
    %106 = vector.extract_strided_slice %93 {offsets = [0, 256], sizes = [8, 128], strides = [1, 1]} : vector<8x512xf32> to vector<8x128xf32>
    %107 = math.tanh %106 : vector<8x128xf32>
    %108 = vector.extract_strided_slice %93 {offsets = [0, 384], sizes = [8, 128], strides = [1, 1]} : vector<8x512xf32> to vector<8x128xf32>
    %109 = arith.negf %108 : vector<8x128xf32>
    %110 = math.exp %109 : vector<8x128xf32>
    %cst_51 = arith.constant 1.000000e+00 : f32
    %111 = vector.broadcast %cst_51 : f32 to vector<8x128xf32>
    %112 = arith.addf %111, %110 : vector<8x128xf32>
    %113 = arith.divf %111, %112 : vector<8x128xf32>
    %c0_52 = arith.constant 0 : index
    %c0_53 = arith.constant 0 : index
    %114 = vector.load %arg9[%c0_52, %c0_53] : memref<8x128xf32, #tpu.memory_space<vmem>>, vector<8x128xf32>
    %115 = arith.mulf %105, %114 : vector<8x128xf32>
    %116 = arith.mulf %99, %107 : vector<8x128xf32>
    %117 = arith.addf %115, %116 : vector<8x128xf32>
    %118 = math.tanh %117 : vector<8x128xf32>
    %119 = arith.mulf %113, %118 : vector<8x128xf32>
    %c0_54 = arith.constant 0 : index
    %c0_55 = arith.constant 0 : index
    %120 = vector.load %arg9[%c0_54, %c0_55] : memref<8x128xf32, #tpu.memory_space<vmem>>, vector<8x128xf32>
    tpu.vector_store %arg9[%c0_54, %c0_55], %117 {strides = array<i32>} : memref<8x128xf32, #tpu.memory_space<vmem>>, vector<8x128xf32>,
    %c0_56 = arith.constant 0 : index
    %c0_57 = arith.constant 0 : index
    %121 = vector.load %arg8[%c0_56, %c0_57] : memref<8x128xf32, #tpu.memory_space<vmem>>, vector<8x128xf32>
    tpu.vector_store %arg8[%c0_56, %c0_57], %119 {strides = array<i32>} : memref<8x128xf32, #tpu.memory_space<vmem>>, vector<8x128xf32>,
    %122 = arith.index_cast %87 : i32 to index
    %c0_58 = arith.constant 0 : index
    %123 = vector.load %arg5[%122, %c0_58] : memref<64x128xf32, #tpu.memory_space<vmem>>, vector<8x128xf32>
    tpu.vector_store %arg5[%122, %c0_58], %119 {strides = array<i32>} : memref<64x128xf32, #tpu.memory_space<vmem>>, vector<8x128xf32>,
    %c3_i32 = arith.constant 3 : i32
    %c8_i32_59 = arith.constant 8 : i32
    %124 = arith.muli %c3_i32, %c8_i32_59 : i32
    %125 = tpu.assume_multiple %124, 8 : i32
    %126 = arith.index_cast %125 : i32 to index
    %c0_60 = arith.constant 0 : index
    %127 = vector.load %arg7[%126, %c0_60] : memref<64x512xf32, #tpu.memory_space<vmem>>, vector<8x512xf32>
    %c0_61 = arith.constant 0 : index
    %c0_62 = arith.constant 0 : index
    %128 = vector.load %arg8[%c0_61, %c0_62] : memref<8x128xf32, #tpu.memory_space<vmem>>, vector<8x128xf32>
    %c0_63 = arith.constant 0 : index
    %c0_64 = arith.constant 0 : index
    %129 = vector.load %arg4[%c0_63, %c0_64] : memref<128x512xf32, #tpu.memory_space<vmem>>, vector<128x512xf32>
    %cst_65 = arith.constant dense<0.000000e+00> : vector<8x512xf32>
    %130 = tpu.matmul %128, %129, %cst_65 {dimension_numbers = #tpu.dot_dimension_numbers<[1], [0], [0], [1], [0, 0, 1, 1], [], []>} : vector<8x128xf32>, vector<128x512xf32>, vector<8x512xf32> -> vector<8x512xf32>
    %131 = arith.addf %127, %130 : vector<8x512xf32>
    %132 = vector.extract_strided_slice %131 {offsets = [0, 0], sizes = [8, 128], strides = [1, 1]} : vector<8x512xf32> to vector<8x128xf32>
    %133 = arith.negf %132 : vector<8x128xf32>
    %134 = math.exp %133 : vector<8x128xf32>
    %cst_66 = arith.constant 1.000000e+00 : f32
    %135 = vector.broadcast %cst_66 : f32 to vector<8x128xf32>
    %136 = arith.addf %135, %134 : vector<8x128xf32>
    %137 = arith.divf %135, %136 : vector<8x128xf32>
    %138 = vector.extract_strided_slice %131 {offsets = [0, 128], sizes = [8, 128], strides = [1, 1]} : vector<8x512xf32> to vector<8x128xf32>
    %139 = arith.negf %138 : vector<8x128xf32>
    %140 = math.exp %139 : vector<8x128xf32>
    %cst_67 = arith.constant 1.000000e+00 : f32
    %141 = vector.broadcast %cst_67 : f32 to vector<8x128xf32>
    %142 = arith.addf %141, %140 : vector<8x128xf32>
    %143 = arith.divf %141, %142 : vector<8x128xf32>
    %144 = vector.extract_strided_slice %131 {offsets = [0, 256], sizes = [8, 128], strides = [1, 1]} : vector<8x512xf32> to vector<8x128xf32>
    %145 = math.tanh %144 : vector<8x128xf32>
    %146 = vector.extract_strided_slice %131 {offsets = [0, 384], sizes = [8, 128], strides = [1, 1]} : vector<8x512xf32> to vector<8x128xf32>
    %147 = arith.negf %146 : vector<8x128xf32>
    %148 = math.exp %147 : vector<8x128xf32>
    %cst_68 = arith.constant 1.000000e+00 : f32
    %149 = vector.broadcast %cst_68 : f32 to vector<8x128xf32>
    %150 = arith.addf %149, %148 : vector<8x128xf32>
    %151 = arith.divf %149, %150 : vector<8x128xf32>
    %c0_69 = arith.constant 0 : index
    %c0_70 = arith.constant 0 : index
    %152 = vector.load %arg9[%c0_69, %c0_70] : memref<8x128xf32, #tpu.memory_space<vmem>>, vector<8x128xf32>
    %153 = arith.mulf %143, %152 : vector<8x128xf32>
    %154 = arith.mulf %137, %145 : vector<8x128xf32>
    %155 = arith.addf %153, %154 : vector<8x128xf32>
    %156 = math.tanh %155 : vector<8x128xf32>
    %157 = arith.mulf %151, %156 : vector<8x128xf32>
    %c0_71 = arith.constant 0 : index
    %c0_72 = arith.constant 0 : index
    %158 = vector.load %arg9[%c0_71, %c0_72] : memref<8x128xf32, #tpu.memory_space<vmem>>, vector<8x128xf32>
    tpu.vector_store %arg9[%c0_71, %c0_72], %155 {strides = array<i32>} : memref<8x128xf32, #tpu.memory_space<vmem>>, vector<8x128xf32>,
    %c0_73 = arith.constant 0 : index
    %c0_74 = arith.constant 0 : index
    %159 = vector.load %arg8[%c0_73, %c0_74] : memref<8x128xf32, #tpu.memory_space<vmem>>, vector<8x128xf32>
    tpu.vector_store %arg8[%c0_73, %c0_74], %157 {strides = array<i32>} : memref<8x128xf32, #tpu.memory_space<vmem>>, vector<8x128xf32>,
    %160 = arith.index_cast %125 : i32 to index
    %c0_75 = arith.constant 0 : index
    %161 = vector.load %arg5[%160, %c0_75] : memref<64x128xf32, #tpu.memory_space<vmem>>, vector<8x128xf32>
    tpu.vector_store %arg5[%160, %c0_75], %157 {strides = array<i32>} : memref<64x128xf32, #tpu.memory_space<vmem>>, vector<8x128xf32>,
    %c4_i32 = arith.constant 4 : i32
    %c8_i32_76 = arith.constant 8 : i32
    %162 = arith.muli %c4_i32, %c8_i32_76 : i32
    %163 = tpu.assume_multiple %162, 8 : i32
    %164 = arith.index_cast %163 : i32 to index
    %c0_77 = arith.constant 0 : index
    %165 = vector.load %arg7[%164, %c0_77] : memref<64x512xf32, #tpu.memory_space<vmem>>, vector<8x512xf32>
    %c0_78 = arith.constant 0 : index
    %c0_79 = arith.constant 0 : index
    %166 = vector.load %arg8[%c0_78, %c0_79] : memref<8x128xf32, #tpu.memory_space<vmem>>, vector<8x128xf32>
    %c0_80 = arith.constant 0 : index
    %c0_81 = arith.constant 0 : index
    %167 = vector.load %arg4[%c0_80, %c0_81] : memref<128x512xf32, #tpu.memory_space<vmem>>, vector<128x512xf32>
    %cst_82 = arith.constant dense<0.000000e+00> : vector<8x512xf32>
    %168 = tpu.matmul %166, %167, %cst_82 {dimension_numbers = #tpu.dot_dimension_numbers<[1], [0], [0], [1], [0, 0, 1, 1], [], []>} : vector<8x128xf32>, vector<128x512xf32>, vector<8x512xf32> -> vector<8x512xf32>
    %169 = arith.addf %165, %168 : vector<8x512xf32>
    %170 = vector.extract_strided_slice %169 {offsets = [0, 0], sizes = [8, 128], strides = [1, 1]} : vector<8x512xf32> to vector<8x128xf32>
    %171 = arith.negf %170 : vector<8x128xf32>
    %172 = math.exp %171 : vector<8x128xf32>
    %cst_83 = arith.constant 1.000000e+00 : f32
    %173 = vector.broadcast %cst_83 : f32 to vector<8x128xf32>
    %174 = arith.addf %173, %172 : vector<8x128xf32>
    %175 = arith.divf %173, %174 : vector<8x128xf32>
    %176 = vector.extract_strided_slice %169 {offsets = [0, 128], sizes = [8, 128], strides = [1, 1]} : vector<8x512xf32> to vector<8x128xf32>
    %177 = arith.negf %176 : vector<8x128xf32>
    %178 = math.exp %177 : vector<8x128xf32>
    %cst_84 = arith.constant 1.000000e+00 : f32
    %179 = vector.broadcast %cst_84 : f32 to vector<8x128xf32>
    %180 = arith.addf %179, %178 : vector<8x128xf32>
    %181 = arith.divf %179, %180 : vector<8x128xf32>
    %182 = vector.extract_strided_slice %169 {offsets = [0, 256], sizes = [8, 128], strides = [1, 1]} : vector<8x512xf32> to vector<8x128xf32>
    %183 = math.tanh %182 : vector<8x128xf32>
    %184 = vector.extract_strided_slice %169 {offsets = [0, 384], sizes = [8, 128], strides = [1, 1]} : vector<8x512xf32> to vector<8x128xf32>
    %185 = arith.negf %184 : vector<8x128xf32>
    %186 = math.exp %185 : vector<8x128xf32>
    %cst_85 = arith.constant 1.000000e+00 : f32
    %187 = vector.broadcast %cst_85 : f32 to vector<8x128xf32>
    %188 = arith.addf %187, %186 : vector<8x128xf32>
    %189 = arith.divf %187, %188 : vector<8x128xf32>
    %c0_86 = arith.constant 0 : index
    %c0_87 = arith.constant 0 : index
    %190 = vector.load %arg9[%c0_86, %c0_87] : memref<8x128xf32, #tpu.memory_space<vmem>>, vector<8x128xf32>
    %191 = arith.mulf %181, %190 : vector<8x128xf32>
    %192 = arith.mulf %175, %183 : vector<8x128xf32>
    %193 = arith.addf %191, %192 : vector<8x128xf32>
    %194 = math.tanh %193 : vector<8x128xf32>
    %195 = arith.mulf %189, %194 : vector<8x128xf32>
    %c0_88 = arith.constant 0 : index
    %c0_89 = arith.constant 0 : index
    %196 = vector.load %arg9[%c0_88, %c0_89] : memref<8x128xf32, #tpu.memory_space<vmem>>, vector<8x128xf32>
    tpu.vector_store %arg9[%c0_88, %c0_89], %193 {strides = array<i32>} : memref<8x128xf32, #tpu.memory_space<vmem>>, vector<8x128xf32>,
    %c0_90 = arith.constant 0 : index
    %c0_91 = arith.constant 0 : index
    %197 = vector.load %arg8[%c0_90, %c0_91] : memref<8x128xf32, #tpu.memory_space<vmem>>, vector<8x128xf32>
    tpu.vector_store %arg8[%c0_90, %c0_91], %195 {strides = array<i32>} : memref<8x128xf32, #tpu.memory_space<vmem>>, vector<8x128xf32>,
    %198 = arith.index_cast %163 : i32 to index
    %c0_92 = arith.constant 0 : index
    %199 = vector.load %arg5[%198, %c0_92] : memref<64x128xf32, #tpu.memory_space<vmem>>, vector<8x128xf32>
    tpu.vector_store %arg5[%198, %c0_92], %195 {strides = array<i32>} : memref<64x128xf32, #tpu.memory_space<vmem>>, vector<8x128xf32>,
    %c5_i32 = arith.constant 5 : i32
    %c8_i32_93 = arith.constant 8 : i32
    %200 = arith.muli %c5_i32, %c8_i32_93 : i32
    %201 = tpu.assume_multiple %200, 8 : i32
    %202 = arith.index_cast %201 : i32 to index
    %c0_94 = arith.constant 0 : index
    %203 = vector.load %arg7[%202, %c0_94] : memref<64x512xf32, #tpu.memory_space<vmem>>, vector<8x512xf32>
    %c0_95 = arith.constant 0 : index
    %c0_96 = arith.constant 0 : index
    %204 = vector.load %arg8[%c0_95, %c0_96] : memref<8x128xf32, #tpu.memory_space<vmem>>, vector<8x128xf32>
    %c0_97 = arith.constant 0 : index
    %c0_98 = arith.constant 0 : index
    %205 = vector.load %arg4[%c0_97, %c0_98] : memref<128x512xf32, #tpu.memory_space<vmem>>, vector<128x512xf32>
    %cst_99 = arith.constant dense<0.000000e+00> : vector<8x512xf32>
    %206 = tpu.matmul %204, %205, %cst_99 {dimension_numbers = #tpu.dot_dimension_numbers<[1], [0], [0], [1], [0, 0, 1, 1], [], []>} : vector<8x128xf32>, vector<128x512xf32>, vector<8x512xf32> -> vector<8x512xf32>
    %207 = arith.addf %203, %206 : vector<8x512xf32>
    %208 = vector.extract_strided_slice %207 {offsets = [0, 0], sizes = [8, 128], strides = [1, 1]} : vector<8x512xf32> to vector<8x128xf32>
    %209 = arith.negf %208 : vector<8x128xf32>
    %210 = math.exp %209 : vector<8x128xf32>
    %cst_100 = arith.constant 1.000000e+00 : f32
    %211 = vector.broadcast %cst_100 : f32 to vector<8x128xf32>
    %212 = arith.addf %211, %210 : vector<8x128xf32>
    %213 = arith.divf %211, %212 : vector<8x128xf32>
    %214 = vector.extract_strided_slice %207 {offsets = [0, 128], sizes = [8, 128], strides = [1, 1]} : vector<8x512xf32> to vector<8x128xf32>
    %215 = arith.negf %214 : vector<8x128xf32>
    %216 = math.exp %215 : vector<8x128xf32>
    %cst_101 = arith.constant 1.000000e+00 : f32
    %217 = vector.broadcast %cst_101 : f32 to vector<8x128xf32>
    %218 = arith.addf %217, %216 : vector<8x128xf32>
    %219 = arith.divf %217, %218 : vector<8x128xf32>
    %220 = vector.extract_strided_slice %207 {offsets = [0, 256], sizes = [8, 128], strides = [1, 1]} : vector<8x512xf32> to vector<8x128xf32>
    %221 = math.tanh %220 : vector<8x128xf32>
    %222 = vector.extract_strided_slice %207 {offsets = [0, 384], sizes = [8, 128], strides = [1, 1]} : vector<8x512xf32> to vector<8x128xf32>
    %223 = arith.negf %222 : vector<8x128xf32>
    %224 = math.exp %223 : vector<8x128xf32>
    %cst_102 = arith.constant 1.000000e+00 : f32
    %225 = vector.broadcast %cst_102 : f32 to vector<8x128xf32>
    %226 = arith.addf %225, %224 : vector<8x128xf32>
    %227 = arith.divf %225, %226 : vector<8x128xf32>
    %c0_103 = arith.constant 0 : index
    %c0_104 = arith.constant 0 : index
    %228 = vector.load %arg9[%c0_103, %c0_104] : memref<8x128xf32, #tpu.memory_space<vmem>>, vector<8x128xf32>
    %229 = arith.mulf %219, %228 : vector<8x128xf32>
    %230 = arith.mulf %213, %221 : vector<8x128xf32>
    %231 = arith.addf %229, %230 : vector<8x128xf32>
    %232 = math.tanh %231 : vector<8x128xf32>
    %233 = arith.mulf %227, %232 : vector<8x128xf32>
    %c0_105 = arith.constant 0 : index
    %c0_106 = arith.constant 0 : index
    %234 = vector.load %arg9[%c0_105, %c0_106] : memref<8x128xf32, #tpu.memory_space<vmem>>, vector<8x128xf32>
    tpu.vector_store %arg9[%c0_105, %c0_106], %231 {strides = array<i32>} : memref<8x128xf32, #tpu.memory_space<vmem>>, vector<8x128xf32>,
    %c0_107 = arith.constant 0 : index
    %c0_108 = arith.constant 0 : index
    %235 = vector.load %arg8[%c0_107, %c0_108] : memref<8x128xf32, #tpu.memory_space<vmem>>, vector<8x128xf32>
    tpu.vector_store %arg8[%c0_107, %c0_108], %233 {strides = array<i32>} : memref<8x128xf32, #tpu.memory_space<vmem>>, vector<8x128xf32>,
    %236 = arith.index_cast %201 : i32 to index
    %c0_109 = arith.constant 0 : index
    %237 = vector.load %arg5[%236, %c0_109] : memref<64x128xf32, #tpu.memory_space<vmem>>, vector<8x128xf32>
    tpu.vector_store %arg5[%236, %c0_109], %233 {strides = array<i32>} : memref<64x128xf32, #tpu.memory_space<vmem>>, vector<8x128xf32>,
    %c6_i32 = arith.constant 6 : i32
    %c8_i32_110 = arith.constant 8 : i32
    %238 = arith.muli %c6_i32, %c8_i32_110 : i32
    %239 = tpu.assume_multiple %238, 8 : i32
    %240 = arith.index_cast %239 : i32 to index
    %c0_111 = arith.constant 0 : index
    %241 = vector.load %arg7[%240, %c0_111] : memref<64x512xf32, #tpu.memory_space<vmem>>, vector<8x512xf32>
    %c0_112 = arith.constant 0 : index
    %c0_113 = arith.constant 0 : index
    %242 = vector.load %arg8[%c0_112, %c0_113] : memref<8x128xf32, #tpu.memory_space<vmem>>, vector<8x128xf32>
    %c0_114 = arith.constant 0 : index
    %c0_115 = arith.constant 0 : index
    %243 = vector.load %arg4[%c0_114, %c0_115] : memref<128x512xf32, #tpu.memory_space<vmem>>, vector<128x512xf32>
    %cst_116 = arith.constant dense<0.000000e+00> : vector<8x512xf32>
    %244 = tpu.matmul %242, %243, %cst_116 {dimension_numbers = #tpu.dot_dimension_numbers<[1], [0], [0], [1], [0, 0, 1, 1], [], []>} : vector<8x128xf32>, vector<128x512xf32>, vector<8x512xf32> -> vector<8x512xf32>
    %245 = arith.addf %241, %244 : vector<8x512xf32>
    %246 = vector.extract_strided_slice %245 {offsets = [0, 0], sizes = [8, 128], strides = [1, 1]} : vector<8x512xf32> to vector<8x128xf32>
    %247 = arith.negf %246 : vector<8x128xf32>
    %248 = math.exp %247 : vector<8x128xf32>
    %cst_117 = arith.constant 1.000000e+00 : f32
    %249 = vector.broadcast %cst_117 : f32 to vector<8x128xf32>
    %250 = arith.addf %249, %248 : vector<8x128xf32>
    %251 = arith.divf %249, %250 : vector<8x128xf32>
    %252 = vector.extract_strided_slice %245 {offsets = [0, 128], sizes = [8, 128], strides = [1, 1]} : vector<8x512xf32> to vector<8x128xf32>
    %253 = arith.negf %252 : vector<8x128xf32>
    %254 = math.exp %253 : vector<8x128xf32>
    %cst_118 = arith.constant 1.000000e+00 : f32
    %255 = vector.broadcast %cst_118 : f32 to vector<8x128xf32>
    %256 = arith.addf %255, %254 : vector<8x128xf32>
    %257 = arith.divf %255, %256 : vector<8x128xf32>
    %258 = vector.extract_strided_slice %245 {offsets = [0, 256], sizes = [8, 128], strides = [1, 1]} : vector<8x512xf32> to vector<8x128xf32>
    %259 = math.tanh %258 : vector<8x128xf32>
    %260 = vector.extract_strided_slice %245 {offsets = [0, 384], sizes = [8, 128], strides = [1, 1]} : vector<8x512xf32> to vector<8x128xf32>
    %261 = arith.negf %260 : vector<8x128xf32>
    %262 = math.exp %261 : vector<8x128xf32>
    %cst_119 = arith.constant 1.000000e+00 : f32
    %263 = vector.broadcast %cst_119 : f32 to vector<8x128xf32>
    %264 = arith.addf %263, %262 : vector<8x128xf32>
    %265 = arith.divf %263, %264 : vector<8x128xf32>
    %c0_120 = arith.constant 0 : index
    %c0_121 = arith.constant 0 : index
    %266 = vector.load %arg9[%c0_120, %c0_121] : memref<8x128xf32, #tpu.memory_space<vmem>>, vector<8x128xf32>
    %267 = arith.mulf %257, %266 : vector<8x128xf32>
    %268 = arith.mulf %251, %259 : vector<8x128xf32>
    %269 = arith.addf %267, %268 : vector<8x128xf32>
    %270 = math.tanh %269 : vector<8x128xf32>
    %271 = arith.mulf %265, %270 : vector<8x128xf32>
    %c0_122 = arith.constant 0 : index
    %c0_123 = arith.constant 0 : index
    %272 = vector.load %arg9[%c0_122, %c0_123] : memref<8x128xf32, #tpu.memory_space<vmem>>, vector<8x128xf32>
    tpu.vector_store %arg9[%c0_122, %c0_123], %269 {strides = array<i32>} : memref<8x128xf32, #tpu.memory_space<vmem>>, vector<8x128xf32>,
    %c0_124 = arith.constant 0 : index
    %c0_125 = arith.constant 0 : index
    %273 = vector.load %arg8[%c0_124, %c0_125] : memref<8x128xf32, #tpu.memory_space<vmem>>, vector<8x128xf32>
    tpu.vector_store %arg8[%c0_124, %c0_125], %271 {strides = array<i32>} : memref<8x128xf32, #tpu.memory_space<vmem>>, vector<8x128xf32>,
    %274 = arith.index_cast %239 : i32 to index
    %c0_126 = arith.constant 0 : index
    %275 = vector.load %arg5[%274, %c0_126] : memref<64x128xf32, #tpu.memory_space<vmem>>, vector<8x128xf32>
    tpu.vector_store %arg5[%274, %c0_126], %271 {strides = array<i32>} : memref<64x128xf32, #tpu.memory_space<vmem>>, vector<8x128xf32>,
    %c7_i32 = arith.constant 7 : i32
    %c8_i32_127 = arith.constant 8 : i32
    %276 = arith.muli %c7_i32, %c8_i32_127 : i32
    %277 = tpu.assume_multiple %276, 8 : i32
    %278 = arith.index_cast %277 : i32 to index
    %c0_128 = arith.constant 0 : index
    %279 = vector.load %arg7[%278, %c0_128] : memref<64x512xf32, #tpu.memory_space<vmem>>, vector<8x512xf32>
    %c0_129 = arith.constant 0 : index
    %c0_130 = arith.constant 0 : index
    %280 = vector.load %arg8[%c0_129, %c0_130] : memref<8x128xf32, #tpu.memory_space<vmem>>, vector<8x128xf32>
    %c0_131 = arith.constant 0 : index
    %c0_132 = arith.constant 0 : index
    %281 = vector.load %arg4[%c0_131, %c0_132] : memref<128x512xf32, #tpu.memory_space<vmem>>, vector<128x512xf32>
    %cst_133 = arith.constant dense<0.000000e+00> : vector<8x512xf32>
    %282 = tpu.matmul %280, %281, %cst_133 {dimension_numbers = #tpu.dot_dimension_numbers<[1], [0], [0], [1], [0, 0, 1, 1], [], []>} : vector<8x128xf32>, vector<128x512xf32>, vector<8x512xf32> -> vector<8x512xf32>
    %283 = arith.addf %279, %282 : vector<8x512xf32>
    %284 = vector.extract_strided_slice %283 {offsets = [0, 0], sizes = [8, 128], strides = [1, 1]} : vector<8x512xf32> to vector<8x128xf32>
    %285 = arith.negf %284 : vector<8x128xf32>
    %286 = math.exp %285 : vector<8x128xf32>
    %cst_134 = arith.constant 1.000000e+00 : f32
    %287 = vector.broadcast %cst_134 : f32 to vector<8x128xf32>
    %288 = arith.addf %287, %286 : vector<8x128xf32>
    %289 = arith.divf %287, %288 : vector<8x128xf32>
    %290 = vector.extract_strided_slice %283 {offsets = [0, 128], sizes = [8, 128], strides = [1, 1]} : vector<8x512xf32> to vector<8x128xf32>
    %291 = arith.negf %290 : vector<8x128xf32>
    %292 = math.exp %291 : vector<8x128xf32>
    %cst_135 = arith.constant 1.000000e+00 : f32
    %293 = vector.broadcast %cst_135 : f32 to vector<8x128xf32>
    %294 = arith.addf %293, %292 : vector<8x128xf32>
    %295 = arith.divf %293, %294 : vector<8x128xf32>
    %296 = vector.extract_strided_slice %283 {offsets = [0, 256], sizes = [8, 128], strides = [1, 1]} : vector<8x512xf32> to vector<8x128xf32>
    %297 = math.tanh %296 : vector<8x128xf32>
    %298 = vector.extract_strided_slice %283 {offsets = [0, 384], sizes = [8, 128], strides = [1, 1]} : vector<8x512xf32> to vector<8x128xf32>
    %299 = arith.negf %298 : vector<8x128xf32>
    %300 = math.exp %299 : vector<8x128xf32>
    %cst_136 = arith.constant 1.000000e+00 : f32
    %301 = vector.broadcast %cst_136 : f32 to vector<8x128xf32>
    %302 = arith.addf %301, %300 : vector<8x128xf32>
    %303 = arith.divf %301, %302 : vector<8x128xf32>
    %c0_137 = arith.constant 0 : index
    %c0_138 = arith.constant 0 : index
    %304 = vector.load %arg9[%c0_137, %c0_138] : memref<8x128xf32, #tpu.memory_space<vmem>>, vector<8x128xf32>
    %305 = arith.mulf %295, %304 : vector<8x128xf32>
    %306 = arith.mulf %289, %297 : vector<8x128xf32>
    %307 = arith.addf %305, %306 : vector<8x128xf32>
    %308 = math.tanh %307 : vector<8x128xf32>
    %309 = arith.mulf %303, %308 : vector<8x128xf32>
    %c0_139 = arith.constant 0 : index
    %c0_140 = arith.constant 0 : index
    %310 = vector.load %arg9[%c0_139, %c0_140] : memref<8x128xf32, #tpu.memory_space<vmem>>, vector<8x128xf32>
    tpu.vector_store %arg9[%c0_139, %c0_140], %307 {strides = array<i32>} : memref<8x128xf32, #tpu.memory_space<vmem>>, vector<8x128xf32>,
    %c0_141 = arith.constant 0 : index
    %c0_142 = arith.constant 0 : index
    %311 = vector.load %arg8[%c0_141, %c0_142] : memref<8x128xf32, #tpu.memory_space<vmem>>, vector<8x128xf32>
    tpu.vector_store %arg8[%c0_141, %c0_142], %309 {strides = array<i32>} : memref<8x128xf32, #tpu.memory_space<vmem>>, vector<8x128xf32>,
    %312 = arith.index_cast %277 : i32 to index
    %c0_143 = arith.constant 0 : index
    %313 = vector.load %arg5[%312, %c0_143] : memref<64x128xf32, #tpu.memory_space<vmem>>, vector<8x128xf32>
    tpu.vector_store %arg5[%312, %c0_143], %309 {strides = array<i32>} : memref<64x128xf32, #tpu.memory_space<vmem>>, vector<8x128xf32>,
    %c8_i32_144 = arith.constant 8 : i32
    %c0_i32_145 = arith.constant 0 : i32
    %314 = arith.cmpi eq, %arg0, %c0_i32_145 : i32
    %315 = arith.extui %314 : i1 to i32
    %c0_i32_146 = arith.constant 0 : i32
    %316 = arith.cmpi ne, %315, %c0_i32_146 : i32
    scf.if %316 {
      %c0_147 = arith.constant 0 : index
      %c0_148 = arith.constant 0 : index
      %317 = vector.load %arg9[%c0_147, %c0_148] : memref<8x128xf32, #tpu.memory_space<vmem>>, vector<8x128xf32>
      %c0_149 = arith.constant 0 : index
      %c0_150 = arith.constant 0 : index
      %318 = vector.load %arg6[%c0_149, %c0_150] : memref<8x128xf32, #tpu.memory_space<vmem>>, vector<8x128xf32>
      tpu.vector_store %arg6[%c0_149, %c0_150], %317 {strides = array<i32>} : memref<8x128xf32, #tpu.memory_space<vmem>>, vector<8x128xf32>,
    } else {
    }
    return
  }
  func.func @transform_0(%arg0: i32) -> (i32, i32) {
    %c0_i32 = arith.constant 0 : i32
    %c0_i32_0 = arith.constant 0 : i32
    return %arg0, %c0_i32 : i32, i32
  }
  func.func @transform_1(%arg0: i32) -> (i32, i32) {
    %c0_i32 = arith.constant 0 : i32
    %c0_i32_0 = arith.constant 0 : i32
    %c0_i32_1 = arith.constant 0 : i32
    return %c0_i32, %c0_i32_0 : i32, i32
  }
  func.func @transform_2(%arg0: i32) -> (i32, i32) {
    %c0_i32 = arith.constant 0 : i32
    %c0_i32_0 = arith.constant 0 : i32
    %c0_i32_1 = arith.constant 0 : i32
    return %c0_i32, %c0_i32_0 : i32, i32
  }
  func.func @transform_3(%arg0: i32) -> (i32, i32) {
    %c0_i32 = arith.constant 0 : i32
    %c0_i32_0 = arith.constant 0 : i32
    %c0_i32_1 = arith.constant 0 : i32
    return %c0_i32, %c0_i32_0 : i32, i32
  }
  func.func @transform_4(%arg0: i32) -> (i32, i32) {
    %c0_i32 = arith.constant 0 : i32
    %c0_i32_0 = arith.constant 0 : i32
    return %arg0, %c0_i32 : i32, i32
  }
  func.func @transform_5(%arg0: i32) -> (i32, i32) {
    %c0_i32 = arith.constant 0 : i32
    %c0_i32_0 = arith.constant 0 : i32
    %c0_i32_1 = arith.constant 0 : i32
    return %c0_i32, %c0_i32_0 : i32, i32
  }
}

</mosaic_0001>

<bundles_post_ra>
// kernel: tpu_custom_call.1
= control target key start
LH: loop header
LB: loop body
LE: loop exit
PB: predicated region body
PF: predicated region fallthrough
CT: control target
= control target key end

     0   :  { %11 = vsyncpa [#allocation6], 0  ;;  %s3872_s0 = inlined_call_operand.vmem [shape: f32[64,32], index: 0, kind: input, shape index: {}]   ;;  %s3873_s1 = inlined_call_operand.hbm [shape: f32[32,512], index: 1, kind: input, shape index: {}]   ;;  %s3874_s2 = inlined_call_operand.vmem [shape: f32[1,512], index: 2, kind: input, shape index: {}]   ;;  %s3875_s3 = inlined_call_operand.hbm [shape: f32[128,512], index: 3, kind: input, shape index: {}]   ;;  %s3876_s4 = inlined_call_operand.hbm [shape: f32[64,128], index: 4, kind: output, shape index: {0}]   ;;  %s3877_s5 = inlined_call_operand.hbm [shape: f32[8,128], index: 5, kind: output, shape index: {1}]  }
   0x1   :  { %12 = vsyncpa [#allocation9], 0 }
   0x2   :  { %13 = vsyncpa [#allocation7], 0 }
   0x3   :  { %14 = vsyncpa [#allocation12], 0  ;;  %s3268_s18 = smov [#allocation5]   ;;  %s3172_s22 = scalar_lea.hbm %s3873_s1, 2048 }
   0x4   :  { %s22_s19 = sshll.u32 %s3268_s18, 4  ;;  %p3173_p0 = scmp.ne.s32.totalorder %s3873_s1, %s3172_s22  ;;  %s23_s19 = int_to_ptr.vmem [resolvable:$true] %s22_s19 }
   0x5   :  { %p3176_p1 = scmp.lt.u32.totalorder %s3172_s22, %s3873_s1 }
   0x7   :  { %p3178_p2 = pnand %p3176_p1, %p3173_p0 }
   0x9   :  { %3181 = shalt.err (!%p3178_p2)
}
   0xa   :  { %s3182_s27 = scalar_lea.vmem %s23_s19, 2048  ;;  %p3187_p4 = scmp.lt.s32.totalorder %s23_s19, %s23_s19 }
   0xb   :  { %p3183_p3 = scmp.ne.s32.totalorder %s23_s19, %s3182_s27  ;;  %p3188_p5 = scmp.lt.s32.totalorder %s3182_s27, %s3182_s27 }
   0xd   :  { %p3189_p6 = por %p3188_p5, %p3187_p4 }
   0xf   :  { %p3190_p7 = pnand %p3189_p6, %p3183_p3 }
  0x11   :  { %3193 = shalt.err (!%p3190_p7)
}
  0x12   :  { %s3269_s28 = smov 512   ;;  %s3270_s29 = smov 32  }
  0x13   :  { %28 = dma.hbm_to_vmem [thread:$0]  %s3873_s1, 2048, %s23_s19, [#allocation6], %s3269_s28, %s3269_s28, %s3270_s29  }
  0x14   :  { %s3271_s7 = smov [#allocation8]   ;;  %s3194_s11 = scalar_lea.hbm %s3875_s3, 8192 }
  0x15   :  { %s36_s8 = sshll.u32 %s3271_s7, 4  ;;  %p3195_p8 = scmp.ne.s32.totalorder %s3875_s3, %s3194_s11  ;;  %s37_s8 = int_to_ptr.vmem [resolvable:$true] %s36_s8 }
  0x16   :  { %p3198_p9 = scmp.lt.u32.totalorder %s3194_s11, %s3875_s3 }
  0x18   :  { %p3200_p10 = pnand %p3198_p9, %p3195_p8 }
  0x1a   :  { %3203 = shalt.err (!%p3200_p10)
}
  0x1b   :  { %s3204_s16 = scalar_lea.vmem %s37_s8, 8192  ;;  %p3209_p12 = scmp.lt.s32.totalorder %s37_s8, %s37_s8 }
  0x1c   :  { %p3205_p11 = scmp.ne.s32.totalorder %s37_s8, %s3204_s16  ;;  %p3210_p13 = scmp.lt.s32.totalorder %s3204_s16, %s3204_s16 }
  0x1e   :  { %p3211_p0 = por %p3210_p13, %p3209_p12 }
  0x20   :  { %p3212_p1 = pnand %p3211_p0, %p3205_p11 }
  0x22   :  { %3215 = shalt.err (!%p3212_p1)
}
  0x23   :  { %42 = dma.hbm_to_vmem [thread:$0]  %s3875_s3, 8192, %s37_s8, [#allocation9], %s3269_s28, %s3269_s28, %s3270_s29  }
  0x24   :  { %3260 = dma.done.wait [#allocation6], 2048  }
  0x25   :  { %3261 = vsyncadd [#allocation6], 4294965248 }
  0x26   :  { %3262 = dma.done.wait [#allocation9], 8192  }
  0x27   :  { %3263 = vsyncadd [#allocation9], 4294959104  ;;  %v3272_v0 = vmov 0.0   ;;  %v64_v1 = vld [vmem:[#allocation5 + $0x8] sm:$0xff]  ;;  %v66_v3 = vld [vmem:[#allocation5 + $0x18] sm:$0xff]  ;;  %vm101_vm0 = vcmask 261120  }
  0x28   :  { %190 = vmatprep.mubr.f32.mxu0 %v3272_v0  ;;  %303 = vmatprep.mubr.f32.mxu1 %v3272_v0  ;;  %v68_v2 = vld [vmem:[#allocation5 + $0x28] sm:$0xff]  ;;  %v70_v5 = vld [vmem:[#allocation5 + $0x38] sm:$0xff]  ;;  %v63_v6 = vld [vmem:[#allocation5] sm:$0xff] }
  0x29   :  { %v2443_v4 = vpack.c.bf16 %v68_v2, %v64_v1  ;;  %v67_v7 = vld [vmem:[#allocation5 + $0x20] sm:$0xff]  ;;  %v2451_v8 = vpack.c.bf16 %v70_v5, %v66_v3  ;;  %v65_v10 = vld [vmem:[#allocation5 + $0x10] sm:$0xff]  ;;  %v72_v12 = vld [vmem:[#allocation5 + $0x48] sm:$0xff] }
  0x2a   :  { %v2445_v9 = vpack.c.bf16 %v67_v7, %v63_v6  ;;  %v69_v11 = vld [vmem:[#allocation5 + $0x30] sm:$0xff]  ;;  %v76_v14 = vld [vmem:[#allocation5 + $0x68] sm:$0xff]  ;;  %v74_v15 = vld [vmem:[#allocation5 + $0x58] sm:$0xff] }
  0x2b   :  { %2444 = vmatprep.subr.bf16.mxu0 %v2443_v4  ;;  %v2453_v13 = vpack.c.bf16 %v69_v11, %v65_v10  ;;  %v78_v16 = vld [vmem:[#allocation5 + $0x78] sm:$0xff]  ;;  %2452 = vmatprep.subr.bf16.mxu1 %v2451_v8  ;;  %v2447_v17 = vpack.c.bf16 %v76_v14, %v72_v12  ;;  %v71_v19 = vld [vmem:[#allocation5 + $0x40] sm:$0xff]  ;;  %v73_v21 = vld [vmem:[#allocation5 + $0x50] sm:$0xff] }
  0x2c   :  { %2446 = vmatpush1.bf16.msra.mxu0 %v2445_v9  ;;  %v2455_v18 = vpack.c.bf16 %v78_v16, %v74_v15  ;;  %v75_v20 = vld [vmem:[#allocation5 + $0x60] sm:$0xff]  ;;  %v77_v23 = vld [vmem:[#allocation5 + $0x70] sm:$0xff]  ;;  %v393_v24 = vld [vmem:[#allocation8 + $0x8] sm:$0xff] }
  0x2d   :  { %2454 = vmatpush1.bf16.msra.mxu1 %v2453_v13  ;;  %v2449_v22 = vpack.c.bf16 %v75_v20, %v71_v19  ;;  %2448 = vmatprep.subr.bf16.mxu0 %v2447_v17  ;;  %v2457_v25 = vpack.c.bf16 %v77_v23, %v73_v21  ;;  %v397_v26 = vld [vmem:[#allocation8 + $0x28] sm:$0xff]  ;;  %v395_v27 = vld [vmem:[#allocation8 + $0x18] sm:$0xff]  ;;  %v392_v31 = vld [vmem:[#allocation8] sm:$0xff] }
  0x2e   :  { %2456 = vmatprep.subr.bf16.mxu1 %v2455_v18  ;;  %v399_v28 = vld [vmem:[#allocation8 + $0x38] sm:$0xff]  ;;  %v3333_v29 = vpack.c.bf16 %v397_v26, %v393_v24  ;;  %v396_v32 = vld [vmem:[#allocation8 + $0x20] sm:$0xff]  ;;  %v394_v33 = vld [vmem:[#allocation8 + $0x10] sm:$0xff] }
  0x2f   :  { %v3335_v30 = vpack.c.bf16 %v399_v28, %v395_v27  ;;  %v55_v34 = vld [vmem:[%s3872_s0] sm:$0xff]  ;;  %v3340_v35 = vpack.c.bf16 %v396_v32, %v392_v31  ;;  %v398_v36 = vld [vmem:[#allocation8 + $0x30] sm:$0xff]  ;;  %v401_v37 = vld [vmem:[#allocation8 + $0x48] sm:$0xff] }
  0x30   :  { %2450 = vmatpush1.bf16.msra.mxu0 %v2449_v22  ;;  %v3343_v38 = vpack.c.bf16 %v398_v36, %v394_v33  ;;  %v405_v39 = vld [vmem:[#allocation8 + $0x68] sm:$0xff]  ;;  %v403_v40 = vld [vmem:[#allocation8 + $0x58] sm:$0xff]  ;;  %v400_v43 = vld [vmem:[#allocation8 + $0x40] sm:$0xff] }
  0x31   :  { %2458 = vmatpush1.bf16.msra.mxu1 %v2457_v25  ;;  %2460 = vmatprep.subr.bf16.mxu0 %v3333_v29  ;;  %v407_v41 = vld [vmem:[#allocation8 + $0x78] sm:$0xff]  ;;  %v3346_v42 = vpack.c.bf16 %v405_v39, %v401_v37  ;;  %v404_v44 = vld [vmem:[#allocation8 + $0x60] sm:$0xff]  ;;  %v402_v45 = vld [vmem:[#allocation8 + $0x50] sm:$0xff] }
  0x32   :  { %2492 = vmatprep.subr.bf16.mxu1 %v3335_v30  ;;  %v56_v46 = vld [vmem:[%s3872_s0 + $0x8] sm:$0xff]  ;;  %v3352_v47 = vpack.c.bf16 %v407_v41, %v403_v40  ;;  %v406_v48 = vld [vmem:[#allocation8 + $0x70] sm:$0xff]  ;;  %v3356_v50 = vpack.c.bf16 %v404_v44, %v400_v43  ;;  %v411_v52 = vld [vmem:[#allocation8 + $0x98] sm:$0xff] }
  0x33   :  { %2403 = vmatmul.mubr.msk.f32.vlgmr.msra.gmra.mrb[0].mxu0 %vm101_vm0, %v55_v34  ;;  %v409_v49 = vld [vmem:[#allocation8 + $0x88] sm:$0xff]  ;;  %v415_v53 = vld [vmem:[#allocation8 + $0xb8] sm:$0xff]  ;;  %v3360_v54 = vpack.c.bf16 %v406_v48, %v402_v45  ;;  %v408_v55 = vld [vmem:[#allocation8 + $0x80] sm:$0xff] }
  0x34   :  { %2411 = vmatmul.mubr.msk.f32.vlgmr.msra.gmra.mrb[0].mxu1 %vm101_vm0, %v55_v34  ;;  %2462 = vmatpush1.bf16.msra.mxu0 %v3340_v35  ;;  %v413_v51 = vld [vmem:[#allocation8 + $0xa8] sm:$0xff]  ;;  %v412_v56 = vld [vmem:[#allocation8 + $0xa0] sm:$0xff]  ;;  %v410_v58 = vld [vmem:[#allocation8 + $0x90] sm:$0xff]  ;;  %v3368_v60 = vpack.c.bf16 %v415_v53, %v411_v52 }
  0x35   :  { %2494 = vmatpush1.bf16.msra.mxu1 %v3343_v38  ;;  %196 = vmatprep.mubr.f32.mxu0 %v3272_v0  ;;  %v3364_v57 = vpack.c.bf16 %v413_v51, %v409_v49  ;;  %v414_v59 = vld [vmem:[#allocation8 + $0xb0] sm:$0xff]  ;;  %v417_v61 = vld [vmem:[#allocation8 + $0xc8] sm:$0xff]  ;;  %v3375_v1 = vpack.c.bf16 %v412_v56, %v408_v55  ;;  %v419_v2 = vld [vmem:[#allocation8 + $0xd8] sm:$0xff] }
  0x36   :  { %309 = vmatprep.mubr.f32.mxu1 %v3272_v0  ;;  %2464 = vmatprep.subr.bf16.mxu0 %v3346_v42  ;;  %v421_v62 = vld [vmem:[#allocation8 + $0xe8] sm:$0xff]  ;;  %v57_v63 = vld [vmem:[%s3872_s0 + $0x10] sm:$0xff]  ;;  %v423_v3 = vld [vmem:[#allocation8 + $0xf8] sm:$0xff]  ;;  %v3379_v4 = vpack.c.bf16 %v414_v59, %v410_v58 }
  0x37   :  { %2404 = vmatmul.mubr.msk.f32.gmra.mrb[2].mxu0 %vm101_vm0, %v56_v46  ;;  %2496 = vmatprep.subr.bf16.mxu1 %v3352_v47  ;;  %v416_v5 = vld [vmem:[#allocation8 + $0xc0] sm:$0xff]  ;;  %v3383_v7 = vpack.c.bf16 %v421_v62, %v417_v61  ;;  %v418_v8 = vld [vmem:[#allocation8 + $0xd0] sm:$0xff]  ;;  %v3387_v10 = vpack.c.bf16 %v423_v3, %v419_v2  ;;  %v425_v11 = vld [vmem:[#allocation8 + $0x108] sm:$0xff] }
  0x38   :  { %2412 = vmatmul.mubr.msk.f32.gmra.mrb[2].mxu1 %vm101_vm0, %v56_v46  ;;  %2466 = vmatpush1.bf16.msra.mxu0 %v3356_v50  ;;  %v420_v6 = vld [vmem:[#allocation8 + $0xe0] sm:$0xff]  ;;  %v422_v9 = vld [vmem:[#allocation8 + $0xf0] sm:$0xff]  ;;  %v429_v12 = vld [vmem:[#allocation8 + $0x128] sm:$0xff] }
  0x39   :  { %2498 = vmatpush1.bf16.msra.mxu1 %v3360_v54  ;;  %202 = vmatprep.mubr.f32.mxu0 %v3272_v0  ;;  %v58_v13 = vld [vmem:[%s3872_s0 + $0x18] sm:$0xff]  ;;  %v3394_v14 = vpack.c.bf16 %v420_v6, %v416_v5  ;;  %v3398_v17 = vpack.c.bf16 %v422_v9, %v418_v8  ;;  %v424_v18 = vld [vmem:[#allocation8 + $0x100] sm:$0xff]  ;;  %v3402_v20 = vpack.c.bf16 %v429_v12, %v425_v11  ;;  %v426_v21 = vld [vmem:[#allocation8 + $0x110] sm:$0xff] }
  0x3a   :  { %315 = vmatprep.mubr.f32.mxu1 %v3272_v0  ;;  %2468 = vmatprep.subr.bf16.mxu0 %v3364_v57  ;;  %v427_v15 = vld [vmem:[#allocation8 + $0x118] sm:$0xff]  ;;  %v428_v19 = vld [vmem:[#allocation8 + $0x120] sm:$0xff]  ;;  %v430_v22 = vld [vmem:[#allocation8 + $0x130] sm:$0xff] }
  0x3b   :  { %2405 = vmatmul.mubr.msk.f32.gmra.mrb[4].mxu0 %vm101_vm0, %v57_v63  ;;  %2500 = vmatprep.subr.bf16.mxu1 %v3368_v60  ;;  %v431_v16 = vld [vmem:[#allocation8 + $0x138] sm:$0xff]  ;;  %v433_v24 = vld [vmem:[#allocation8 + $0x148] sm:$0xff]  ;;  %v59_v26 = vld [vmem:[%s3872_s0 + $0x20] sm:$0xff]  ;;  %v3413_v27 = vpack.c.bf16 %v428_v19, %v424_v18  ;;  %v3417_v32 = vpack.c.bf16 %v430_v22, %v426_v21  ;;  %v81_v19 = vlaneseq }
  0x3c   :  { %2413 = vmatmul.mubr.msk.f32.gmra.mrb[4].mxu1 %vm101_vm0, %v57_v63  ;;  %2470 = vmatpush1.bf16.msra.mxu0 %v3375_v1  ;;  %v3406_v23 = vpack.c.bf16 %v431_v16, %v427_v15  ;;  %v437_v25 = vld [vmem:[#allocation8 + $0x168] sm:$0xff]  ;;  %v435_v28 = vld [vmem:[#allocation8 + $0x158] sm:$0xff]  ;;  %v432_v33 = vld [vmem:[#allocation8 + $0x140] sm:$0xff] }
  0x3d   :  { %2502 = vmatpush1.bf16.msra.mxu1 %v3379_v4  ;;  %208 = vmatprep.mubr.f32.mxu0 %v3272_v0  ;;  %v439_v31 = vld [vmem:[#allocation8 + $0x178] sm:$0xff]  ;;  %v436_v34 = vld [vmem:[#allocation8 + $0x160] sm:$0xff]  ;;  %v3421_v36 = vpack.c.bf16 %v437_v25, %v433_v24  ;;  %v434_v37 = vld [vmem:[#allocation8 + $0x150] sm:$0xff]  ;;  %v82_v21 = vshrl.u32 %v81_v19, 7 }
  0x3e   :  { %321 = vmatprep.mubr.f32.mxu1 %v3272_v0  ;;  %2472 = vmatprep.subr.bf16.mxu0 %v3383_v7  ;;  %v438_v39 = vld [vmem:[#allocation8 + $0x170] sm:$0xff]  ;;  %v3425_v40 = vpack.c.bf16 %v439_v31, %v435_v28  ;;  %v441_v41 = vld [vmem:[#allocation8 + $0x188] sm:$0xff]  ;;  %v3432_v45 = vpack.c.bf16 %v436_v34, %v432_v33  ;;  %v443_v46 = vld [vmem:[#allocation8 + $0x198] sm:$0xff] }
  0x3f   :  { %2406 = vmatmul.mubr.msk.f32.gmra.mrb[6].mxu0 %vm101_vm0, %v58_v13  ;;  %2504 = vmatprep.subr.bf16.mxu1 %v3387_v10  ;;  %v445_v43 = vld [vmem:[#allocation8 + $0x1a8] sm:$0xff]  ;;  %v447_v48 = vld [vmem:[#allocation8 + $0x1b8] sm:$0xff]  ;;  %v3436_v49 = vpack.c.bf16 %v438_v39, %v434_v37  ;;  %v440_v51 = vld [vmem:[#allocation8 + $0x180] sm:$0xff]  ;;  %v83_v22 = vsub.s32 0, %v82_v21  ;;  %v87_v25 = vsub.s32 1, %v82_v21  ;;  %v95_v33 = vsub.s32 3, %v82_v21 }
  0x40   :  { %2414 = vmatmul.mubr.msk.f32.gmra.mrb[6].mxu1 %vm101_vm0, %v58_v13  ;;  %2474 = vmatpush1.bf16.msra.mxu0 %v3394_v14  ;;  %v60_v44 = vld [vmem:[%s3872_s0 + $0x28] sm:$0xff]  ;;  %v444_v52 = vld [vmem:[#allocation8 + $0x1a0] sm:$0xff]  ;;  %v3440_v53 = vpack.c.bf16 %v445_v43, %v441_v41  ;;  %v442_v55 = vld [vmem:[#allocation8 + $0x190] sm:$0xff]  ;;  %v3444_v58 = vpack.c.bf16 %v447_v48, %v443_v46  ;;  %v91_v46 = vsub.s32 2, %v82_v21 }
  0x41   :  { %2506 = vmatpush1.bf16.msra.mxu1 %v3398_v17  ;;  %214 = vmatprep.mubr.f32.mxu0 %v3272_v0  ;;  %v446_v56 = vld [vmem:[#allocation8 + $0x1b0] sm:$0xff]  ;;  %v449_v59 = vld [vmem:[#allocation8 + $0x1c8] sm:$0xff]  ;;  %v3451_v63 = vpack.c.bf16 %v444_v52, %v440_v51  ;;  %v451_v2 = vld [vmem:[#allocation8 + $0x1d8] sm:$0xff] }
  0x42   :  { %327 = vmatprep.mubr.f32.mxu1 %v3272_v0  ;;  %2476 = vmatprep.subr.bf16.mxu0 %v3402_v20  ;;  %v453_v61 = vld [vmem:[#allocation8 + $0x1e8] sm:$0xff]  ;;  %v61_v62 = vld [vmem:[%s3872_s0 + $0x30] sm:$0xff]  ;;  %v455_v3 = vld [vmem:[#allocation8 + $0x1f8] sm:$0xff]  ;;  %v3455_v5 = vpack.c.bf16 %v446_v56, %v442_v55 }
  0x43   :  { %2407 = vmatmul.mubr.msk.f32.gmra.mrb[8].mxu0 %vm101_vm0, %v59_v26  ;;  %2508 = vmatprep.subr.bf16.mxu1 %v3406_v23  ;;  %v448_v6 = vld [vmem:[#allocation8 + $0x1c0] sm:$0xff]  ;;  %v3459_v9 = vpack.c.bf16 %v453_v61, %v449_v59  ;;  %v450_v11 = vld [vmem:[#allocation8 + $0x1d0] sm:$0xff]  ;;  %v3463_v13 = vpack.c.bf16 %v455_v3, %v451_v2  ;;  %v62_v15 = vld [vmem:[%s3872_s0 + $0x38] sm:$0xff] }
  0x44   :  { %2415 = vmatmul.mubr.msk.f32.gmra.mrb[8].mxu1 %vm101_vm0, %v59_v26  ;;  %2478 = vmatpush1.bf16.msra.mxu0 %v3413_v27  ;;  %v452_v8 = vld [vmem:[#allocation8 + $0x1e0] sm:$0xff]  ;;  %v454_v12 = vld [vmem:[#allocation8 + $0x1f0] sm:$0xff] }
  0x45   :  { %2510 = vmatpush1.bf16.msra.mxu1 %v3417_v32  ;;  %220 = vmatprep.mubr.f32.mxu0 %v3272_v0  ;;  %v3470_v16 = vpack.c.bf16 %v452_v8, %v448_v6  ;;  %v3474_v18 = vpack.c.bf16 %v454_v12, %v450_v11  ;;  %v79_v24 = vld [vmem:[%s3874_s2] sm:$0xf]  ;;  %s3273_s2 = smov [#allocation11]  }
  0x46   :  { %333 = vmatprep.mubr.f32.mxu1 %v3272_v0  ;;  %2480 = vmatprep.subr.bf16.mxu0 %v3421_v36  ;;  %v3526_v26 = vrot.slane %v79_v24, %v83_v22  ;;  %v3528_v28 = vrot.slane %v79_v24, %v87_v25  ;;  %v3535_v51 = vrot.slane %v79_v24, %v91_v46  ;;  %s2382_s9 = sshll.u32 %s3273_s2, 4  ;;  %s2383_s9 = int_to_ptr.vmem [resolvable:$true] %s2382_s9 }
  0x47   :  { %2408 = vmatmul.mubr.msk.f32.gmra.mrb[10].mxu0 %vm101_vm0, %v60_v44  ;;  %2512 = vmatprep.subr.bf16.mxu1 %v3425_v40  ;;  %s3216_s10 = scalar_lea.vmem %s2383_s9, 128  ;;  %p3221_p3 = scmp.lt.s32.totalorder %s2383_s9, %s2383_s9 }
  0x48   :  { %2416 = vmatmul.mubr.msk.f32.gmra.mrb[10].mxu1 %vm101_vm0, %v60_v44  ;;  %2482 = vmatpush1.bf16.msra.mxu0 %v3432_v45  ;;  %v3532_v44 = vrot.slane %v79_v24, %v95_v33  ;;  %p3217_p2 = scmp.ne.s32.totalorder %s2383_s9, %s3216_s10  ;;  %p3222_p4 = scmp.lt.s32.totalorder %s3216_s10, %s3216_s10 }
  0x49   :  { %2514 = vmatpush1.bf16.msra.mxu1 %v3436_v49  ;;  %226 = vmatprep.mubr.f32.mxu0 %v3272_v0 }
  0x4a   :  { %339 = vmatprep.mubr.f32.mxu1 %v3272_v0  ;;  %2484 = vmatprep.subr.bf16.mxu0 %v3440_v53  ;;  %p3223_p5 = por %p3222_p4, %p3221_p3 }
  0x4b   :  { %2409 = vmatmul.mubr.msk.f32.gmra.mrb[12].mxu0 %vm101_vm0, %v61_v62  ;;  %2516 = vmatprep.subr.bf16.mxu1 %v3444_v58 }
  0x4c   :  { %2417 = vmatmul.mubr.msk.f32.gmra.mrb[12].mxu1 %vm101_vm0, %v61_v62  ;;  %2486 = vmatpush1.bf16.msra.mxu0 %v3451_v63  ;;  %p3224_p6 = pnand %p3223_p5, %p3217_p2 }
  0x4d   :  { %2518 = vmatpush1.bf16.msra.mxu1 %v3455_v5  ;;  %232 = vmatprep.mubr.f32.mxu0 %v3272_v0 }
  0x4e   :  { %345 = vmatprep.mubr.f32.mxu1 %v3272_v0  ;;  %2488 = vmatprep.subr.bf16.mxu0 %v3459_v9 }
  0x4f   :  { %2410 = vmatmul.mubr.msk.f32.gmra.mrb[14].mxu0 %vm101_vm0, %v62_v15  ;;  %2520 = vmatprep.subr.bf16.mxu1 %v3463_v13 }
  0x50   :  { %2418 = vmatmul.mubr.msk.f32.gmra.mrb[14].mxu1 %vm101_vm0, %v62_v15  ;;  %2490 = vmatpush1.bf16.msra.mxu0 %v3470_v16 }
  0x51   :  { %2522 = vmatpush1.bf16.msra.mxu1 %v3474_v18  ;;  %520 = vmatprep.mubr.f32.mxu0 %v3272_v0 }
  0x52   :  { %591 = vmatprep.mubr.f32.mxu1 %v3272_v0  ;;  %2524 = vmatprep.subr.bf16.mxu0 %v3333_v29 }
  0x53   :  { %521 = vmatmul.mubr.f32.vlgmr.msra.gmra.mrb[0].mxu0 %v3272_v0  ;;  %2556 = vmatprep.subr.bf16.mxu1 %v3335_v30 }
  0x54   :  { %592 = vmatmul.mubr.f32.vlgmr.msra.gmra.mrb[0].mxu1 %v3272_v0  ;;  %2526 = vmatpush1.bf16.msra.mxu0 %v3340_v35 }
  0x55   :  { %2558 = vmatpush1.bf16.msra.mxu1 %v3343_v38  ;;  %2528 = vmatprep.subr.bf16.mxu0 %v3346_v42 }
  0x56   :  { %2560 = vmatprep.subr.bf16.mxu1 %v3352_v47  ;;  %766 = vmatprep.mubr.f32.mxu0 %v3272_v0 }
  0x57   :  { %837 = vmatprep.mubr.f32.mxu1 %v3272_v0 }
  0x58   :  { %2530 = vmatpush1.bf16.msra.mxu0 %v3356_v50 }
  0x59   :  { %2562 = vmatpush1.bf16.msra.mxu1 %v3360_v54  ;;  %2532 = vmatprep.subr.bf16.mxu0 %v3364_v57 }
  0x5a   :  { %2564 = vmatprep.subr.bf16.mxu1 %v3368_v60 }
  0x5c   :  { %2534 = vmatpush1.bf16.msra.mxu0 %v3375_v1 }
  0x5d   :  { %2566 = vmatpush1.bf16.msra.mxu1 %v3379_v4  ;;  %2536 = vmatprep.subr.bf16.mxu0 %v3383_v7 }
  0x5e   :  { %2568 = vmatprep.subr.bf16.mxu1 %v3387_v10 }
  0x60   :  { %2538 = vmatpush1.bf16.msra.mxu0 %v3394_v14 }
  0x61   :  { %2570 = vmatpush1.bf16.msra.mxu1 %v3398_v17  ;;  %2540 = vmatprep.subr.bf16.mxu0 %v3402_v20 }
  0x62   :  { %2572 = vmatprep.subr.bf16.mxu1 %v3406_v23 }
  0x64   :  { %2542 = vmatpush1.bf16.msra.mxu0 %v3413_v27 }
  0x65   :  { %2574 = vmatpush1.bf16.msra.mxu1 %v3417_v32  ;;  %2544 = vmatprep.subr.bf16.mxu0 %v3421_v36 }
  0x66   :  { %2576 = vmatprep.subr.bf16.mxu1 %v3425_v40 }
  0x68   :  { %2546 = vmatpush1.bf16.msra.mxu0 %v3432_v45 }
  0x69   :  { %2578 = vmatpush1.bf16.msra.mxu1 %v3436_v49  ;;  %2548 = vmatprep.subr.bf16.mxu0 %v3440_v53 }
  0x6a   :  { %2580 = vmatprep.subr.bf16.mxu1 %v3444_v58 }
  0x6c   :  { %2550 = vmatpush1.bf16.msra.mxu0 %v3451_v63 }
  0x6d   :  { %2582 = vmatpush1.bf16.msra.mxu1 %v3455_v5  ;;  %2552 = vmatprep.subr.bf16.mxu0 %v3459_v9 }
  0x6e   :  { %2584 = vmatprep.subr.bf16.mxu1 %v3463_v13 }
  0x70   :  { %2554 = vmatpush1.bf16.msra.mxu0 %v3470_v16 }
  0x71   :  { %2586 = vmatpush1.bf16.msra.mxu1 %v3474_v18  ;;  %2588 = vmatprep.subr.bf16.mxu0 %v3333_v29 }
  0x72   :  { %2620 = vmatprep.subr.bf16.mxu1 %v3335_v30 }
 0x126   :  { %v522_v31 = vpop.f32.mrb[0].mxu0 }
 0x127   :  { %v2971_v34 = vadd.f32 %v522_v31, %v3526_v26  ;;  %v593_v37 = vpop.f32.mrb[0].mxu1  ;;  %v524_v29 = vpop.f32.mrb[1].mxu0 }
 0x128   :  { %v2972_v30 = vadd.f32 %v524_v29, %v3528_v28  ;;  %v595_v39 = vpop.f32.mrb[1].mxu1  ;;  %v2987_v55 = vadd.f32 %v593_v37, %v3535_v51 }
 0x129   :  { %v2419_v41 = vmul.f32 -1.442695, %v2971_v34  ;;  %v2988_v48 = vadd.f32 %v595_v39, %v3532_v44 }
 0x12a   :  { %v2420_v43 = vmul.f32 -1.442695, %v2972_v30 }
 0x12b   :  { %3044 = vpow2.f32 %v2419_v41  ;;  %v2421_v52 = vmul.f32 -1.442695, %v2988_v48 }
 0x12c   :  { %3046 = vpow2.f32 %v2420_v43 }
 0x12d   :  { %3048 = vpow2.f32 %v2421_v52 }
 0x12e   :  { %3050 = vtanh.f32 %v2987_v55 }
 0x135   :  { %v3045_v56 = vpop.eup %3044 }
 0x136   :  { %v3047_v59 = vpop.eup %3046  ;;  %v605_v61 = vadd.f32 1.0, %v3045_v56 }
 0x137   :  { %v611_v62 = vadd.f32 1.0, %v3047_v59  ;;  %v3049_v2 = vpop.eup %3048 }
 0x138   :  { %3052 = vrcp.f32 %v605_v61  ;;  %v3051_v3 = vpop.eup %3050  ;;  %v618_v12 = vadd.f32 1.0, %v3049_v2 }
 0x139   :  { %3054 = vrcp.f32 %v611_v62 }
 0x13a   :  { %3056 = vrcp.f32 %v618_v12 }
 0x142   :  { %v3053_v6 = vpop.eup %3052 }
 0x143   :  { %v3055_v8 = vpop.eup %3054  ;;  %v623_v11 = vmul.f32 %v3053_v6, %v3051_v3  ;;  %v1133_v6 = vld [vmem:[#allocation8 + $0x8] sm:$0xff] }
 0x144   :  { %v622_v15 = vmul.f32 0.0, %v3055_v8  ;;  %v3057_v21 = vpop.eup %3056  ;;  %v1137_v8 = vld [vmem:[#allocation8 + $0x28] sm:$0xff] }
 0x145   :  { %v3583_v12 = vpack.c.bf16 %v1137_v8, %v1133_v6  ;;  %v1397_v6 = vld [vmem:[#allocation8 + $0x90] sm:$0xff] }
 0x146   :  { %v3538_v19 = vadd.f32 %v623_v11, %v622_v15  ;;  %v1135_v11 = vld [vmem:[#allocation8 + $0x18] sm:$0xff]  ;;  %v1401_v8 = vld [vmem:[#allocation8 + $0xb0] sm:$0xff] }
 0x147   :  { %v1139_v15 = vld [vmem:[#allocation8 + $0x38] sm:$0xff] }
 0x148   :  { %3058 = vtanh.f32 %v3538_v19 }
 0x152   :  { %v3059_v22 = vpop.eup %3058 }
 0x153   :  { %v626_v24 = vmul.f32 %v3059_v22, %v3057_v21  ;;  %v1136_v21 = vld [vmem:[#allocation8 + $0x20] sm:$0xff]  ;;  %v3585_v22 = vpack.c.bf16 %v1139_v15, %v1135_v11  ;;  %v3656_v11 = vpack.c.bf16 %v1401_v8, %v1397_v6  ;;  %v1404_v15 = vld [vmem:[#allocation8 + $0xc8] sm:$0xff]  ;;  %v1429_v6 = vld [vmem:[#allocation8 + $0x190] sm:$0xff] }
 0x155   :  { %629 = vst [vmem:[#allocation10] sm:$0xff] %v626_v24  ;;  %767 = vmatmul.mubr.f32.vlgmr.msra.gmra.mrb[2].mxu0 %v626_v24  ;;  %838 = vmatmul.mubr.f32.vlgmr.msra.gmra.mrb[2].mxu1 %v626_v24 }
 0x156   :  { %2590 = vmatpush1.bf16.msra.mxu0 %v3340_v35  ;;  %2622 = vmatpush1.bf16.msra.mxu1 %v3343_v38 }
 0x157   :  { %2592 = vmatprep.subr.bf16.mxu0 %v3346_v42  ;;  %2624 = vmatprep.subr.bf16.mxu1 %v3352_v47 }
 0x158   :  { %1013 = vmatprep.mubr.f32.mxu0 %v3272_v0  ;;  %1084 = vmatprep.mubr.f32.mxu1 %v3272_v0 }
 0x15a   :  { %2594 = vmatpush1.bf16.msra.mxu0 %v3356_v50  ;;  %2626 = vmatpush1.bf16.msra.mxu1 %v3360_v54 }
 0x15b   :  { %2596 = vmatprep.subr.bf16.mxu0 %v3364_v57  ;;  %2628 = vmatprep.subr.bf16.mxu1 %v3368_v60 }
 0x15e   :  { %2598 = vmatpush1.bf16.msra.mxu0 %v3375_v1  ;;  %2630 = vmatpush1.bf16.msra.mxu1 %v3379_v4 }
 0x15f   :  { %2600 = vmatprep.subr.bf16.mxu0 %v3383_v7  ;;  %2632 = vmatprep.subr.bf16.mxu1 %v3387_v10 }
 0x162   :  { %2602 = vmatpush1.bf16.msra.mxu0 %v3394_v14  ;;  %2634 = vmatpush1.bf16.msra.mxu1 %v3398_v17 }
 0x163   :  { %2604 = vmatprep.subr.bf16.mxu0 %v3402_v20  ;;  %2636 = vmatprep.subr.bf16.mxu1 %v3406_v23 }
 0x166   :  { %2606 = vmatpush1.bf16.msra.mxu0 %v3413_v27  ;;  %2638 = vmatpush1.bf16.msra.mxu1 %v3417_v32 }
 0x167   :  { %2608 = vmatprep.subr.bf16.mxu0 %v3421_v36  ;;  %2640 = vmatprep.subr.bf16.mxu1 %v3425_v40 }
 0x16a   :  { %2610 = vmatpush1.bf16.msra.mxu0 %v3432_v45  ;;  %2642 = vmatpush1.bf16.msra.mxu1 %v3436_v49 }
 0x16b   :  { %2612 = vmatprep.subr.bf16.mxu0 %v3440_v53  ;;  %2644 = vmatprep.subr.bf16.mxu1 %v3444_v58 }
 0x16e   :  { %2614 = vmatpush1.bf16.msra.mxu0 %v3451_v63  ;;  %2646 = vmatpush1.bf16.msra.mxu1 %v3455_v5 }
 0x16f   :  { %2616 = vmatprep.subr.bf16.mxu0 %v3459_v9  ;;  %2648 = vmatprep.subr.bf16.mxu1 %v3463_v13 }
 0x172   :  { %2618 = vmatpush1.bf16.msra.mxu0 %v3470_v16  ;;  %2650 = vmatpush1.bf16.msra.mxu1 %v3474_v18 }
 0x173   :  { %2652 = vmatprep.subr.bf16.mxu0 %v3583_v12  ;;  %2684 = vmatprep.subr.bf16.mxu1 %v3585_v22 }
 0x228   :  { %v768_v35 = vpop.f32.mrb[2].mxu0  ;;  %v839_v38 = vpop.f32.mrb[2].mxu1 }
 0x229   :  { %v2973_v42 = vadd.f32 %v768_v35, %v3526_v26  ;;  %v770_v47 = vpop.f32.mrb[3].mxu0  ;;  %v841_v50 = vpop.f32.mrb[3].mxu1  ;;  %v2989_v37 = vadd.f32 %v839_v38, %v3535_v51  ;;  %v1134_v35 = vld [vmem:[#allocation8 + $0x10] sm:$0xff] }
 0x22a   :  { %v2974_v54 = vadd.f32 %v770_v47, %v3528_v28  ;;  %v2990_v33 = vadd.f32 %v841_v50, %v3532_v44  ;;  %v1138_v38 = vld [vmem:[#allocation8 + $0x30] sm:$0xff]  ;;  %v1141_v47 = vld [vmem:[#allocation8 + $0x48] sm:$0xff] }
 0x22b   :  { %v2422_v25 = vmul.f32 -1.442695, %v2973_v42  ;;  %v3590_v42 = vpack.c.bf16 %v1138_v38, %v1134_v35  ;;  %v1145_v50 = vld [vmem:[#allocation8 + $0x68] sm:$0xff]  ;;  %v1410_v38 = vld [vmem:[#allocation8 + $0xf8] sm:$0xff] }
 0x22c   :  { %v2423_v31 = vmul.f32 -1.442695, %v2974_v54  ;;  %v2424_v34 = vmul.f32 -1.442695, %v2990_v33  ;;  %v1143_v54 = vld [vmem:[#allocation8 + $0x58] sm:$0xff]  ;;  %v1140_v33 = vld [vmem:[#allocation8 + $0x40] sm:$0xff] }
 0x22d   :  { %3060 = vpow2.f32 %v2422_v25  ;;  %v3595_v25 = vpack.c.bf16 %v1145_v50, %v1141_v47  ;;  %v1403_v47 = vld [vmem:[#allocation8 + $0xc0] sm:$0xff] }
 0x22e   :  { %3062 = vpow2.f32 %v2423_v31  ;;  %v1147_v31 = vld [vmem:[#allocation8 + $0x78] sm:$0xff]  ;;  %v1407_v50 = vld [vmem:[#allocation8 + $0xe0] sm:$0xff] }
 0x22f   :  { %3064 = vpow2.f32 %v2424_v34  ;;  %v1144_v34 = vld [vmem:[#allocation8 + $0x60] sm:$0xff] }
 0x230   :  { %3066 = vtanh.f32 %v2989_v37  ;;  %v3597_v37 = vpack.c.bf16 %v1147_v31, %v1143_v54  ;;  %v3665_v31 = vpack.c.bf16 %v1407_v50, %v1403_v47  ;;  %v1438_v50 = vld [vmem:[#allocation8 + $0x1d8] sm:$0xff] }
 0x237   :  { %v3061_v29 = vpop.eup %3060 }
 0x238   :  { %v3063_v30 = vpop.eup %3062  ;;  %v851_v39 = vadd.f32 1.0, %v3061_v29  ;;  %v3599_v29 = vpack.c.bf16 %v1144_v34, %v1140_v33  ;;  %v1405_v33 = vld [vmem:[#allocation8 + $0xd0] sm:$0xff] }
 0x239   :  { %v857_v41 = vadd.f32 1.0, %v3063_v30  ;;  %v3065_v43 = vpop.eup %3064  ;;  %v1142_v30 = vld [vmem:[#allocation8 + $0x50] sm:$0xff] }
 0x23a   :  { %3068 = vrcp.f32 %v851_v39  ;;  %v3067_v46 = vpop.eup %3066  ;;  %v864_v56 = vadd.f32 1.0, %v3065_v43  ;;  %v1146_v39 = vld [vmem:[#allocation8 + $0x70] sm:$0xff] }
 0x23b   :  { %3070 = vrcp.f32 %v857_v41  ;;  %v3602_v41 = vpack.c.bf16 %v1146_v39, %v1142_v30  ;;  %v1409_v34 = vld [vmem:[#allocation8 + $0xf0] sm:$0xff]  ;;  %v1412_v39 = vld [vmem:[#allocation8 + $0x108] sm:$0xff] }
 0x23c   :  { %3072 = vrcp.f32 %v864_v56  ;;  %v3668_v30 = vpack.c.bf16 %v1409_v34, %v1405_v33  ;;  %v1442_v33 = vld [vmem:[#allocation8 + $0x1f8] sm:$0xff]  ;;  %v1435_v34 = vld [vmem:[#allocation8 + $0x1c0] sm:$0xff] }
 0x244   :  { %v3069_v48 = vpop.eup %3068 }
 0x245   :  { %v3071_v52 = vpop.eup %3070  ;;  %v869_v55 = vmul.f32 %v3069_v48, %v3067_v46  ;;  %v1396_v48 = vld [vmem:[#allocation8 + $0x88] sm:$0xff] }
 0x246   :  { %v868_v59 = vmul.f32 %v3071_v52, %v3538_v19  ;;  %v3073_v62 = vpop.eup %3072  ;;  %v1132_v19 = vld [vmem:[#allocation8] sm:$0xff]  ;;  %v1400_v52 = vld [vmem:[#allocation8 + $0xa8] sm:$0xff] }
 0x247   :  { %v3587_v24 = vpack.c.bf16 %v1136_v21, %v1132_v19  ;;  %v3649_v56 = vpack.c.bf16 %v1400_v52, %v1396_v48  ;;  %v1408_v19 = vld [vmem:[#allocation8 + $0xe8] sm:$0xff]  ;;  %v1406_v21 = vld [vmem:[#allocation8 + $0xd8] sm:$0xff] }
 0x248   :  { %v3578_v61 = vadd.f32 %v869_v55, %v868_v59  ;;  %v1398_v55 = vld [vmem:[#allocation8 + $0x98] sm:$0xff]  ;;  %v3661_v35 = vpack.c.bf16 %v1408_v19, %v1404_v15  ;;  %v3663_v54 = vpack.c.bf16 %v1410_v38, %v1406_v21  ;;  %v1433_v15 = vld [vmem:[#allocation8 + $0x1b0] sm:$0xff]  ;;  %v1436_v19 = vld [vmem:[#allocation8 + $0x1c8] sm:$0xff] }
 0x249   :  { %v1402_v59 = vld [vmem:[#allocation8 + $0xb8] sm:$0xff]  ;;  %v1440_v21 = vld [vmem:[#allocation8 + $0x1e8] sm:$0xff]  ;;  %v3704_v38 = vpack.c.bf16 %v1433_v15, %v1429_v6 }
 0x24a   :  { %3074 = vtanh.f32 %v3578_v61  ;;  %v1430_v48 = vld [vmem:[#allocation8 + $0x198] sm:$0xff]  ;;  %v3706_v47 = vpack.c.bf16 %v1440_v21, %v1436_v19 }
 0x24b   :  { %v1434_v52 = vld [vmem:[#allocation8 + $0x1b8] sm:$0xff] }
 0x254   :  { %v3075_v2 = vpop.eup %3074 }
 0x255   :  { %v872_v3 = vmul.f32 %v3075_v2, %v3073_v62  ;;  %v1399_v62 = vld [vmem:[#allocation8 + $0xa0] sm:$0xff]  ;;  %v3651_v2 = vpack.c.bf16 %v1402_v59, %v1398_v55  ;;  %v3697_v59 = vpack.c.bf16 %v1434_v52, %v1430_v48 }
 0x257   :  { %876 = vst [vmem:[#allocation10 + $0x8] sm:$0xff] %v872_v3  ;;  %1014 = vmatmul.mubr.f32.vlgmr.msra.gmra.mrb[4].mxu0 %v872_v3  ;;  %1085 = vmatmul.mubr.f32.vlgmr.msra.gmra.mrb[4].mxu1 %v872_v3 }
 0x258   :  { %1260 = vmatprep.mubr.f32.mxu0 %v3272_v0  ;;  %1331 = vmatprep.mubr.f32.mxu1 %v3272_v0 }
 0x259   :  { %2654 = vmatpush1.bf16.msra.mxu0 %v3587_v24  ;;  %2686 = vmatpush1.bf16.msra.mxu1 %v3590_v42 }
 0x25a   :  { %2656 = vmatprep.subr.bf16.mxu0 %v3595_v25  ;;  %2688 = vmatprep.subr.bf16.mxu1 %v3597_v37 }
 0x25d   :  { %2658 = vmatpush1.bf16.msra.mxu0 %v3599_v29  ;;  %2690 = vmatpush1.bf16.msra.mxu1 %v3602_v41 }
 0x25e   :  { %2660 = vmatprep.subr.bf16.mxu0 %v3364_v57  ;;  %2692 = vmatprep.subr.bf16.mxu1 %v3368_v60 }
 0x261   :  { %2662 = vmatpush1.bf16.msra.mxu0 %v3375_v1  ;;  %2694 = vmatpush1.bf16.msra.mxu1 %v3379_v4 }
 0x262   :  { %2664 = vmatprep.subr.bf16.mxu0 %v3383_v7  ;;  %2696 = vmatprep.subr.bf16.mxu1 %v3387_v10 }
 0x265   :  { %2666 = vmatpush1.bf16.msra.mxu0 %v3394_v14  ;;  %2698 = vmatpush1.bf16.msra.mxu1 %v3398_v17 }
 0x266   :  { %2668 = vmatprep.subr.bf16.mxu0 %v3402_v20  ;;  %2700 = vmatprep.subr.bf16.mxu1 %v3406_v23 }
 0x269   :  { %2670 = vmatpush1.bf16.msra.mxu0 %v3413_v27  ;;  %2702 = vmatpush1.bf16.msra.mxu1 %v3417_v32 }
 0x26a   :  { %2672 = vmatprep.subr.bf16.mxu0 %v3421_v36  ;;  %2704 = vmatprep.subr.bf16.mxu1 %v3425_v40 }
 0x26d   :  { %2674 = vmatpush1.bf16.msra.mxu0 %v3432_v45  ;;  %2706 = vmatpush1.bf16.msra.mxu1 %v3436_v49 }
 0x26e   :  { %2676 = vmatprep.subr.bf16.mxu0 %v3440_v53  ;;  %2708 = vmatprep.subr.bf16.mxu1 %v3444_v58 }
 0x271   :  { %2678 = vmatpush1.bf16.msra.mxu0 %v3451_v63  ;;  %2710 = vmatpush1.bf16.msra.mxu1 %v3455_v5 }
 0x272   :  { %2680 = vmatprep.subr.bf16.mxu0 %v3459_v9  ;;  %2712 = vmatprep.subr.bf16.mxu1 %v3463_v13 }
 0x275   :  { %2682 = vmatpush1.bf16.msra.mxu0 %v3470_v16  ;;  %2714 = vmatpush1.bf16.msra.mxu1 %v3474_v18 }
 0x276   :  { %2716 = vmatprep.subr.bf16.mxu0 %v3583_v12  ;;  %2748 = vmatprep.subr.bf16.mxu1 %v3585_v22 }
 0x32a   :  { %v1015_v57 = vpop.f32.mrb[4].mxu0  ;;  %v1086_v60 = vpop.f32.mrb[4].mxu1 }
 0x32b   :  { %v2975_v1 = vadd.f32 %v1015_v57, %v3526_v26  ;;  %v1017_v4 = vpop.f32.mrb[5].mxu0  ;;  %v1088_v7 = vpop.f32.mrb[5].mxu1  ;;  %v2991_v27 = vadd.f32 %v1086_v60, %v3535_v51  ;;  %v1416_v57 = vld [vmem:[#allocation8 + $0x128] sm:$0xff]  ;;  %v1414_v60 = vld [vmem:[#allocation8 + $0x118] sm:$0xff] }
 0x32c   :  { %v2976_v10 = vadd.f32 %v1017_v4, %v3528_v28  ;;  %v2992_v20 = vadd.f32 %v1088_v7, %v3532_v44  ;;  %v1418_v4 = vld [vmem:[#allocation8 + $0x138] sm:$0xff]  ;;  %v1411_v7 = vld [vmem:[#allocation8 + $0x100] sm:$0xff] }
 0x32d   :  { %v2425_v14 = vmul.f32 -1.442695, %v2975_v1  ;;  %v3673_v1 = vpack.c.bf16 %v1416_v57, %v1412_v39  ;;  %v3709_v39 = vpack.c.bf16 %v1442_v33, %v1438_v50  ;;  %v1439_v57 = vld [vmem:[#allocation8 + $0x1e0] sm:$0xff] }
 0x32e   :  { %v2426_v17 = vmul.f32 -1.442695, %v2976_v10  ;;  %v2427_v23 = vmul.f32 -1.442695, %v2992_v20  ;;  %v1415_v10 = vld [vmem:[#allocation8 + $0x120] sm:$0xff]  ;;  %v1413_v20 = vld [vmem:[#allocation8 + $0x110] sm:$0xff] }
 0x32f   :  { %3076 = vpow2.f32 %v2425_v14  ;;  %v3675_v14 = vpack.c.bf16 %v1418_v4, %v1414_v60  ;;  %v1437_v60 = vld [vmem:[#allocation8 + $0x1d0] sm:$0xff] }
 0x330   :  { %3078 = vpow2.f32 %v2426_v17  ;;  %v3677_v17 = vpack.c.bf16 %v1415_v10, %v1411_v7  ;;  %v1441_v4 = vld [vmem:[#allocation8 + $0x1f0] sm:$0xff]  ;;  %v3712_v7 = vpack.c.bf16 %v1439_v57, %v1435_v34 }
 0x331   :  { %3080 = vpow2.f32 %v2427_v23  ;;  %v1417_v23 = vld [vmem:[#allocation8 + $0x130] sm:$0xff]  ;;  %v3716_v10 = vpack.c.bf16 %v1441_v4, %v1437_v60 }
 0x332   :  { %3082 = vtanh.f32 %v2991_v27  ;;  %v3680_v27 = vpack.c.bf16 %v1417_v23, %v1413_v20 }
 0x339   :  { %v3077_v32 = vpop.eup %3076 }
 0x33a   :  { %v3079_v36 = vpop.eup %3078  ;;  %v1098_v40 = vadd.f32 1.0, %v3077_v32  ;;  %v1420_v32 = vld [vmem:[#allocation8 + $0x148] sm:$0xff] }
 0x33b   :  { %v1104_v45 = vadd.f32 1.0, %v3079_v36  ;;  %v3081_v49 = vpop.eup %3080  ;;  %v1424_v36 = vld [vmem:[#allocation8 + $0x168] sm:$0xff] }
 0x33c   :  { %3084 = vrcp.f32 %v1098_v40  ;;  %v3083_v53 = vpop.eup %3082  ;;  %v1111_v9 = vadd.f32 1.0, %v3081_v49  ;;  %v1422_v40 = vld [vmem:[#allocation8 + $0x158] sm:$0xff] }
 0x33d   :  { %3086 = vrcp.f32 %v1104_v45  ;;  %v3684_v45 = vpack.c.bf16 %v1424_v36, %v1420_v32  ;;  %v1426_v49 = vld [vmem:[#allocation8 + $0x178] sm:$0xff] }
 0x33e   :  { %3088 = vrcp.f32 %v1111_v9  ;;  %v1421_v9 = vld [vmem:[#allocation8 + $0x150] sm:$0xff] }
 0x346   :  { %v3085_v58 = vpop.eup %3084 }
 0x347   :  { %v3087_v63 = vpop.eup %3086  ;;  %v1116_v5 = vmul.f32 %v3085_v58, %v3083_v53  ;;  %v1419_v53 = vld [vmem:[#allocation8 + $0x140] sm:$0xff] }
 0x348   :  { %v1115_v13 = vmul.f32 %v3087_v63, %v3578_v61  ;;  %v3089_v18 = vpop.eup %3088  ;;  %v1395_v61 = vld [vmem:[#allocation8 + $0x80] sm:$0xff]  ;;  %v3687_v63 = vpack.c.bf16 %v1426_v49, %v1422_v40 }
 0x349   :  { %v3653_v3 = vpack.c.bf16 %v1399_v62, %v1395_v61  ;;  %v1423_v58 = vld [vmem:[#allocation8 + $0x160] sm:$0xff] }
 0x34a   :  { %v3638_v16 = vadd.f32 %v1116_v5, %v1115_v13  ;;  %v3689_v5 = vpack.c.bf16 %v1423_v58, %v1419_v53  ;;  %v1425_v13 = vld [vmem:[#allocation8 + $0x170] sm:$0xff]  ;;  %v1427_v61 = vld [vmem:[#allocation8 + $0x180] sm:$0xff] }
 0x34b   :  { %v1431_v62 = vld [vmem:[#allocation8 + $0x1a0] sm:$0xff] }
 0x34c   :  { %3090 = vtanh.f32 %v3638_v16  ;;  %v3700_v8 = vpack.c.bf16 %v1431_v62, %v1427_v61 }
 0x356   :  { %v3091_v43 = vpop.eup %3090 }
 0x357   :  { %v1119_v46 = vmul.f32 %v3091_v43, %v3089_v18  ;;  %v1428_v18 = vld [vmem:[#allocation8 + $0x188] sm:$0xff]  ;;  %v3692_v43 = vpack.c.bf16 %v1425_v13, %v1421_v9 }
 0x359   :  { %1123 = vst [vmem:[#allocation10 + $0x10] sm:$0xff] %v1119_v46  ;;  %1261 = vmatmul.mubr.f32.vlgmr.msra.gmra.mrb[6].mxu0 %v1119_v46  ;;  %1332 = vmatmul.mubr.f32.vlgmr.msra.gmra.mrb[6].mxu1 %v1119_v46  ;;  %v1432_v46 = vld [vmem:[#allocation8 + $0x1a8] sm:$0xff] }
 0x35a   :  { %2718 = vmatpush1.bf16.msra.mxu0 %v3587_v24  ;;  %2750 = vmatpush1.bf16.msra.mxu1 %v3590_v42  ;;  %v3695_v55 = vpack.c.bf16 %v1432_v46, %v1428_v18 }
 0x35b   :  { %2720 = vmatprep.subr.bf16.mxu0 %v3595_v25  ;;  %2752 = vmatprep.subr.bf16.mxu1 %v3597_v37 }
 0x35c   :  { %1507 = vmatprep.mubr.f32.mxu0 %v3272_v0  ;;  %1578 = vmatprep.mubr.f32.mxu1 %v3272_v0 }
 0x35e   :  { %2722 = vmatpush1.bf16.msra.mxu0 %v3599_v29  ;;  %2754 = vmatpush1.bf16.msra.mxu1 %v3602_v41 }
 0x35f   :  { %2724 = vmatprep.subr.bf16.mxu0 %v3649_v56  ;;  %2756 = vmatprep.subr.bf16.mxu1 %v3651_v2 }
 0x362   :  { %2726 = vmatpush1.bf16.msra.mxu0 %v3653_v3  ;;  %2758 = vmatpush1.bf16.msra.mxu1 %v3656_v11 }
 0x363   :  { %2728 = vmatprep.subr.bf16.mxu0 %v3661_v35  ;;  %2760 = vmatprep.subr.bf16.mxu1 %v3663_v54 }
 0x366   :  { %2730 = vmatpush1.bf16.msra.mxu0 %v3665_v31  ;;  %2762 = vmatpush1.bf16.msra.mxu1 %v3668_v30 }
 0x367   :  { %2732 = vmatprep.subr.bf16.mxu0 %v3673_v1  ;;  %2764 = vmatprep.subr.bf16.mxu1 %v3675_v14 }
 0x36a   :  { %2734 = vmatpush1.bf16.msra.mxu0 %v3677_v17  ;;  %2766 = vmatpush1.bf16.msra.mxu1 %v3680_v27 }
 0x36b   :  { %2736 = vmatprep.subr.bf16.mxu0 %v3684_v45  ;;  %2768 = vmatprep.subr.bf16.mxu1 %v3687_v63 }
 0x36e   :  { %2738 = vmatpush1.bf16.msra.mxu0 %v3689_v5  ;;  %2770 = vmatpush1.bf16.msra.mxu1 %v3692_v43 }
 0x36f   :  { %2740 = vmatprep.subr.bf16.mxu0 %v3695_v55  ;;  %2772 = vmatprep.subr.bf16.mxu1 %v3697_v59 }
 0x372   :  { %2742 = vmatpush1.bf16.msra.mxu0 %v3700_v8  ;;  %2774 = vmatpush1.bf16.msra.mxu1 %v3704_v38 }
 0x373   :  { %2744 = vmatprep.subr.bf16.mxu0 %v3706_v47  ;;  %2776 = vmatprep.subr.bf16.mxu1 %v3709_v39 }
 0x376   :  { %2746 = vmatpush1.bf16.msra.mxu0 %v3712_v7  ;;  %2778 = vmatpush1.bf16.msra.mxu1 %v3716_v10 }
 0x377   :  { %2780 = vmatprep.subr.bf16.mxu0 %v3583_v12  ;;  %2812 = vmatprep.subr.bf16.mxu1 %v3585_v22 }
 0x42c   :  { %v1262_v20 = vpop.f32.mrb[6].mxu0  ;;  %v1333_v23 = vpop.f32.mrb[6].mxu1 }
 0x42d   :  { %v2977_v32 = vadd.f32 %v1262_v20, %v3526_v26  ;;  %v1264_v36 = vpop.f32.mrb[7].mxu0  ;;  %v1335_v40 = vpop.f32.mrb[7].mxu1  ;;  %v2993_v18 = vadd.f32 %v1333_v23, %v3535_v51 }
 0x42e   :  { %v2978_v49 = vadd.f32 %v1264_v36, %v3528_v28  ;;  %v2994_v9 = vadd.f32 %v1335_v40, %v3532_v44 }
 0x42f   :  { %v2428_v53 = vmul.f32 -1.442695, %v2977_v32 }
 0x430   :  { %v2429_v58 = vmul.f32 -1.442695, %v2978_v49  ;;  %v2430_v13 = vmul.f32 -1.442695, %v2994_v9 }
 0x431   :  { %3092 = vpow2.f32 %v2428_v53 }
 0x432   :  { %3094 = vpow2.f32 %v2429_v58 }
 0x433   :  { %3096 = vpow2.f32 %v2430_v13 }
 0x434   :  { %3098 = vtanh.f32 %v2993_v18 }
 0x43b   :  { %v3093_v46 = vpop.eup %3092 }
 0x43c   :  { %v3095_v48 = vpop.eup %3094  ;;  %v1345_v52 = vadd.f32 1.0, %v3093_v46 }
 0x43d   :  { %v1351_v61 = vadd.f32 1.0, %v3095_v48  ;;  %v3097_v62 = vpop.eup %3096 }
 0x43e   :  { %3100 = vrcp.f32 %v1345_v52  ;;  %v3099_v6 = vpop.eup %3098  ;;  %v1358_v50 = vadd.f32 1.0, %v3097_v62 }
 0x43f   :  { %3102 = vrcp.f32 %v1351_v61 }
 0x440   :  { %3104 = vrcp.f32 %v1358_v50 }
 0x448   :  { %v3101_v15 = vpop.eup %3100 }
 0x449   :  { %v3103_v19 = vpop.eup %3102  ;;  %v1363_v21 = vmul.f32 %v3101_v15, %v3099_v6 }
 0x44a   :  { %v1362_v33 = vmul.f32 %v3103_v19, %v3638_v16  ;;  %v3105_v57 = vpop.eup %3104 }
 0x44c   :  { %v3728_v34 = vadd.f32 %v1363_v21, %v1362_v33 }
 0x44e   :  { %3106 = vtanh.f32 %v3728_v34 }
 0x458   :  { %v3107_v60 = vpop.eup %3106 }
 0x459   :  { %v1366_v4 = vmul.f32 %v3107_v60, %v3105_v57 }
 0x45b   :  { %1370 = vst [vmem:[#allocation10 + $0x18] sm:$0xff] %v1366_v4  ;;  %1508 = vmatmul.mubr.f32.vlgmr.msra.gmra.mrb[8].mxu0 %v1366_v4  ;;  %1579 = vmatmul.mubr.f32.vlgmr.msra.gmra.mrb[8].mxu1 %v1366_v4 }
 0x45c   :  { %2782 = vmatpush1.bf16.msra.mxu0 %v3587_v24  ;;  %2814 = vmatpush1.bf16.msra.mxu1 %v3590_v42 }
 0x45d   :  { %2784 = vmatprep.subr.bf16.mxu0 %v3595_v25  ;;  %2816 = vmatprep.subr.bf16.mxu1 %v3597_v37 }
 0x45e   :  { %1754 = vmatprep.mubr.f32.mxu0 %v3272_v0  ;;  %1825 = vmatprep.mubr.f32.mxu1 %v3272_v0 }
 0x460   :  { %2786 = vmatpush1.bf16.msra.mxu0 %v3599_v29  ;;  %2818 = vmatpush1.bf16.msra.mxu1 %v3602_v41 }
 0x461   :  { %2788 = vmatprep.subr.bf16.mxu0 %v3649_v56  ;;  %2820 = vmatprep.subr.bf16.mxu1 %v3651_v2 }
 0x464   :  { %2790 = vmatpush1.bf16.msra.mxu0 %v3653_v3  ;;  %2822 = vmatpush1.bf16.msra.mxu1 %v3656_v11 }
 0x465   :  { %2792 = vmatprep.subr.bf16.mxu0 %v3661_v35  ;;  %2824 = vmatprep.subr.bf16.mxu1 %v3663_v54 }
 0x468   :  { %2794 = vmatpush1.bf16.msra.mxu0 %v3665_v31  ;;  %2826 = vmatpush1.bf16.msra.mxu1 %v3668_v30 }
 0x469   :  { %2796 = vmatprep.subr.bf16.mxu0 %v3673_v1  ;;  %2828 = vmatprep.subr.bf16.mxu1 %v3675_v14 }
 0x46c   :  { %2798 = vmatpush1.bf16.msra.mxu0 %v3677_v17  ;;  %2830 = vmatpush1.bf16.msra.mxu1 %v3680_v27 }
 0x46d   :  { %2800 = vmatprep.subr.bf16.mxu0 %v3684_v45  ;;  %2832 = vmatprep.subr.bf16.mxu1 %v3687_v63 }
 0x470   :  { %2802 = vmatpush1.bf16.msra.mxu0 %v3689_v5  ;;  %2834 = vmatpush1.bf16.msra.mxu1 %v3692_v43 }
 0x471   :  { %2804 = vmatprep.subr.bf16.mxu0 %v3695_v55  ;;  %2836 = vmatprep.subr.bf16.mxu1 %v3697_v59 }
 0x474   :  { %2806 = vmatpush1.bf16.msra.mxu0 %v3700_v8  ;;  %2838 = vmatpush1.bf16.msra.mxu1 %v3704_v38 }
 0x475   :  { %2808 = vmatprep.subr.bf16.mxu0 %v3706_v47  ;;  %2840 = vmatprep.subr.bf16.mxu1 %v3709_v39 }
 0x478   :  { %2810 = vmatpush1.bf16.msra.mxu0 %v3712_v7  ;;  %2842 = vmatpush1.bf16.msra.mxu1 %v3716_v10 }
 0x479   :  { %2844 = vmatprep.subr.bf16.mxu0 %v3583_v12  ;;  %2876 = vmatprep.subr.bf16.mxu1 %v3585_v22 }
 0x52e   :  { %v1509_v16 = vpop.f32.mrb[8].mxu0  ;;  %v1580_v20 = vpop.f32.mrb[8].mxu1 }
 0x52f   :  { %v2979_v23 = vadd.f32 %v1509_v16, %v3526_v26  ;;  %v1511_v32 = vpop.f32.mrb[9].mxu0  ;;  %v1582_v36 = vpop.f32.mrb[9].mxu1  ;;  %v2995_v13 = vadd.f32 %v1580_v20, %v3535_v51 }
 0x530   :  { %v2980_v40 = vadd.f32 %v1511_v32, %v3528_v28  ;;  %v2996_v58 = vadd.f32 %v1582_v36, %v3532_v44 }
 0x531   :  { %v2431_v49 = vmul.f32 -1.442695, %v2979_v23 }
 0x532   :  { %v2432_v53 = vmul.f32 -1.442695, %v2980_v40  ;;  %v2433_v9 = vmul.f32 -1.442695, %v2996_v58 }
 0x533   :  { %3108 = vpow2.f32 %v2431_v49 }
 0x534   :  { %3110 = vpow2.f32 %v2432_v53 }
 0x535   :  { %3112 = vpow2.f32 %v2433_v9 }
 0x536   :  { %3114 = vtanh.f32 %v2995_v13 }
 0x53d   :  { %v3109_v12 = vpop.eup %3108 }
 0x53e   :  { %v3111_v18 = vpop.eup %3110  ;;  %v1592_v22 = vadd.f32 1.0, %v3109_v12 }
 0x53f   :  { %v1598_v46 = vadd.f32 1.0, %v3111_v18  ;;  %v3113_v48 = vpop.eup %3112 }
 0x540   :  { %3116 = vrcp.f32 %v1592_v22  ;;  %v3115_v52 = vpop.eup %3114  ;;  %v1605_v15 = vadd.f32 1.0, %v3113_v48 }
 0x541   :  { %3118 = vrcp.f32 %v1598_v46 }
 0x542   :  { %3120 = vrcp.f32 %v1605_v15 }
 0x54a   :  { %v3117_v61 = vpop.eup %3116 }
 0x54b   :  { %v3119_v62 = vpop.eup %3118  ;;  %v1610_v6 = vmul.f32 %v3117_v61, %v3115_v52  ;;  %v2121_v61 = vld [vmem:[#allocation8 + $0x8] sm:$0xff] }
 0x54c   :  { %v1609_v19 = vmul.f32 %v3119_v62, %v3728_v34  ;;  %v3121_v50 = vpop.eup %3120  ;;  %v2125_v62 = vld [vmem:[#allocation8 + $0x28] sm:$0xff] }
 0x54d   :  { %v2907_v15 = vpack.c.bf16 %v2125_v62, %v2121_v61 }
 0x54e   :  { %v3770_v21 = vadd.f32 %v1610_v6, %v1609_v19  ;;  %v2123_v6 = vld [vmem:[#allocation8 + $0x18] sm:$0xff] }
 0x54f   :  { %v2127_v19 = vld [vmem:[#allocation8 + $0x38] sm:$0xff] }
 0x550   :  { %3122 = vtanh.f32 %v3770_v21 }
 0x55a   :  { %v3123_v33 = vpop.eup %3122 }
 0x55b   :  { %v1613_v57 = vmul.f32 %v3123_v33, %v3121_v50  ;;  %v2124_v50 = vld [vmem:[#allocation8 + $0x20] sm:$0xff]  ;;  %v2939_v33 = vpack.c.bf16 %v2127_v19, %v2123_v6 }
 0x55d   :  { %1617 = vst [vmem:[#allocation10 + $0x20] sm:$0xff] %v1613_v57  ;;  %1755 = vmatmul.mubr.f32.vlgmr.msra.gmra.mrb[10].mxu0 %v1613_v57  ;;  %1826 = vmatmul.mubr.f32.vlgmr.msra.gmra.mrb[10].mxu1 %v1613_v57 }
 0x55e   :  { %2846 = vmatpush1.bf16.msra.mxu0 %v3587_v24  ;;  %2878 = vmatpush1.bf16.msra.mxu1 %v3590_v42 }
 0x55f   :  { %2848 = vmatprep.subr.bf16.mxu0 %v3595_v25  ;;  %2880 = vmatprep.subr.bf16.mxu1 %v3597_v37 }
 0x560   :  { %2001 = vmatprep.mubr.f32.mxu0 %v3272_v0  ;;  %2072 = vmatprep.mubr.f32.mxu1 %v3272_v0 }
 0x562   :  { %2850 = vmatpush1.bf16.msra.mxu0 %v3599_v29  ;;  %2882 = vmatpush1.bf16.msra.mxu1 %v3602_v41 }
 0x563   :  { %2852 = vmatprep.subr.bf16.mxu0 %v3649_v56  ;;  %2884 = vmatprep.subr.bf16.mxu1 %v3651_v2 }
 0x566   :  { %2854 = vmatpush1.bf16.msra.mxu0 %v3653_v3  ;;  %2886 = vmatpush1.bf16.msra.mxu1 %v3656_v11 }
 0x567   :  { %2856 = vmatprep.subr.bf16.mxu0 %v3661_v35  ;;  %2888 = vmatprep.subr.bf16.mxu1 %v3663_v54 }
 0x56a   :  { %2858 = vmatpush1.bf16.msra.mxu0 %v3665_v31  ;;  %2890 = vmatpush1.bf16.msra.mxu1 %v3668_v30 }
 0x56b   :  { %2860 = vmatprep.subr.bf16.mxu0 %v3673_v1  ;;  %2892 = vmatprep.subr.bf16.mxu1 %v3675_v14 }
 0x56e   :  { %2862 = vmatpush1.bf16.msra.mxu0 %v3677_v17  ;;  %2894 = vmatpush1.bf16.msra.mxu1 %v3680_v27 }
 0x56f   :  { %2864 = vmatprep.subr.bf16.mxu0 %v3684_v45  ;;  %2896 = vmatprep.subr.bf16.mxu1 %v3687_v63 }
 0x572   :  { %2866 = vmatpush1.bf16.msra.mxu0 %v3689_v5  ;;  %2898 = vmatpush1.bf16.msra.mxu1 %v3692_v43 }
 0x573   :  { %2868 = vmatprep.subr.bf16.mxu0 %v3695_v55  ;;  %2900 = vmatprep.subr.bf16.mxu1 %v3697_v59 }
 0x576   :  { %2870 = vmatpush1.bf16.msra.mxu0 %v3700_v8  ;;  %2902 = vmatpush1.bf16.msra.mxu1 %v3704_v38 }
 0x577   :  { %2872 = vmatprep.subr.bf16.mxu0 %v3706_v47  ;;  %2904 = vmatprep.subr.bf16.mxu1 %v3709_v39 }
 0x57a   :  { %2874 = vmatpush1.bf16.msra.mxu0 %v3712_v7  ;;  %2906 = vmatpush1.bf16.msra.mxu1 %v3716_v10 }
 0x57b   :  { %2908 = vmatprep.subr.bf16.mxu0 %v2907_v15  ;;  %2940 = vmatprep.subr.bf16.mxu1 %v2939_v33 }
 0x630   :  { %v1756_v24 = vpop.f32.mrb[10].mxu0  ;;  %v1827_v42 = vpop.f32.mrb[10].mxu1 }
 0x631   :  { %v2981_v25 = vadd.f32 %v1756_v24, %v3526_v26  ;;  %v1758_v37 = vpop.f32.mrb[11].mxu0  ;;  %v1829_v29 = vpop.f32.mrb[11].mxu1  ;;  %v2997_v20 = vadd.f32 %v1827_v42, %v3535_v51  ;;  %v2122_v24 = vld [vmem:[#allocation8 + $0x10] sm:$0xff] }
 0x632   :  { %v2982_v41 = vadd.f32 %v1758_v37, %v3528_v28  ;;  %v2998_v4 = vadd.f32 %v1829_v29, %v3532_v44  ;;  %v2126_v42 = vld [vmem:[#allocation8 + $0x30] sm:$0xff]  ;;  %v2129_v37 = vld [vmem:[#allocation8 + $0x48] sm:$0xff] }
 0x633   :  { %v2434_v34 = vmul.f32 -1.442695, %v2981_v25  ;;  %v2941_v25 = vpack.c.bf16 %v2126_v42, %v2122_v24  ;;  %v2133_v29 = vld [vmem:[#allocation8 + $0x68] sm:$0xff] }
 0x634   :  { %v2435_v60 = vmul.f32 -1.442695, %v2982_v41  ;;  %v2436_v16 = vmul.f32 -1.442695, %v2998_v4  ;;  %v2131_v41 = vld [vmem:[#allocation8 + $0x58] sm:$0xff]  ;;  %v2132_v4 = vld [vmem:[#allocation8 + $0x60] sm:$0xff] }
 0x635   :  { %3124 = vpow2.f32 %v2434_v34  ;;  %v2135_v34 = vld [vmem:[#allocation8 + $0x78] sm:$0xff] }
 0x636   :  { %3126 = vpow2.f32 %v2435_v60  ;;  %v2128_v60 = vld [vmem:[#allocation8 + $0x40] sm:$0xff] }
 0x637   :  { %3128 = vpow2.f32 %v2436_v16  ;;  %v2943_v16 = vpack.c.bf16 %v2135_v34, %v2131_v41 }
 0x638   :  { %3130 = vtanh.f32 %v2997_v20  ;;  %v2913_v20 = vpack.c.bf16 %v2132_v4, %v2128_v60 }
 0x63f   :  { %v3125_v23 = vpop.eup %3124 }
 0x640   :  { %v3127_v32 = vpop.eup %3126  ;;  %v1839_v36 = vadd.f32 1.0, %v3125_v23  ;;  %v2130_v23 = vld [vmem:[#allocation8 + $0x50] sm:$0xff] }
 0x641   :  { %v1845_v40 = vadd.f32 1.0, %v3127_v32  ;;  %v3129_v49 = vpop.eup %3128  ;;  %v2134_v32 = vld [vmem:[#allocation8 + $0x70] sm:$0xff] }
 0x642   :  { %3132 = vrcp.f32 %v1839_v36  ;;  %v3131_v53 = vpop.eup %3130  ;;  %v1852_v12 = vadd.f32 1.0, %v3129_v49  ;;  %v2945_v36 = vpack.c.bf16 %v2134_v32, %v2130_v23 }
 0x643   :  { %3134 = vrcp.f32 %v1845_v40 }
 0x644   :  { %3136 = vrcp.f32 %v1852_v12 }
 0x64c   :  { %v3133_v58 = vpop.eup %3132 }
 0x64d   :  { %v3135_v9 = vpop.eup %3134  ;;  %v1857_v13 = vmul.f32 %v3133_v58, %v3131_v53 }
 0x64e   :  { %v1856_v18 = vmul.f32 %v3135_v9, %v3770_v21  ;;  %v3137_v46 = vpop.eup %3136  ;;  %v2120_v21 = vld [vmem:[#allocation8] sm:$0xff] }
 0x64f   :  { %v2909_v57 = vpack.c.bf16 %v2124_v50, %v2120_v21 }
 0x650   :  { %v3810_v22 = vadd.f32 %v1857_v13, %v1856_v18 }
 0x652   :  { %3138 = vtanh.f32 %v3810_v22 }
 0x65c   :  { %v3139_v48 = vpop.eup %3138 }
 0x65d   :  { %v1860_v52 = vmul.f32 %v3139_v48, %v3137_v46 }
 0x65f   :  { %1864 = vst [vmem:[#allocation10 + $0x28] sm:$0xff] %v1860_v52  ;;  %2002 = vmatmul.mubr.f32.vlgmr.msra.gmra.mrb[12].mxu0 %v1860_v52  ;;  %2073 = vmatmul.mubr.f32.vlgmr.msra.gmra.mrb[12].mxu1 %v1860_v52 }
 0x660   :  { %2248 = vmatprep.mubr.f32.mxu0 %v3272_v0  ;;  %2319 = vmatprep.mubr.f32.mxu1 %v3272_v0  ;;  %v2911_v0 = vpack.c.bf16 %v2133_v29, %v2129_v37 }
 0x661   :  { %2910 = vmatpush1.bf16.msra.mxu0 %v2909_v57  ;;  %2942 = vmatpush1.bf16.msra.mxu1 %v2941_v25 }
 0x662   :  { %2912 = vmatprep.subr.bf16.mxu0 %v2911_v0  ;;  %2944 = vmatprep.subr.bf16.mxu1 %v2943_v16 }
 0x665   :  { %2914 = vmatpush1.bf16.msra.mxu0 %v2913_v20  ;;  %2946 = vmatpush1.bf16.msra.mxu1 %v2945_v36 }
 0x666   :  { %2916 = vmatprep.subr.bf16.mxu0 %v3649_v56  ;;  %2948 = vmatprep.subr.bf16.mxu1 %v3651_v2 }
 0x669   :  { %2918 = vmatpush1.bf16.msra.mxu0 %v3653_v3  ;;  %2950 = vmatpush1.bf16.msra.mxu1 %v3656_v11 }
 0x66a   :  { %2920 = vmatprep.subr.bf16.mxu0 %v3661_v35  ;;  %2952 = vmatprep.subr.bf16.mxu1 %v3663_v54 }
 0x66d   :  { %2922 = vmatpush1.bf16.msra.mxu0 %v3665_v31  ;;  %2954 = vmatpush1.bf16.msra.mxu1 %v3668_v30 }
 0x66e   :  { %2924 = vmatprep.subr.bf16.mxu0 %v3673_v1  ;;  %2956 = vmatprep.subr.bf16.mxu1 %v3675_v14 }
 0x671   :  { %2926 = vmatpush1.bf16.msra.mxu0 %v3677_v17  ;;  %2958 = vmatpush1.bf16.msra.mxu1 %v3680_v27 }
 0x672   :  { %2928 = vmatprep.subr.bf16.mxu0 %v3684_v45  ;;  %2960 = vmatprep.subr.bf16.mxu1 %v3687_v63 }
 0x675   :  { %2930 = vmatpush1.bf16.msra.mxu0 %v3689_v5  ;;  %2962 = vmatpush1.bf16.msra.mxu1 %v3692_v43 }
 0x676   :  { %2932 = vmatprep.subr.bf16.mxu0 %v3695_v55  ;;  %2964 = vmatprep.subr.bf16.mxu1 %v3697_v59 }
 0x679   :  { %2934 = vmatpush1.bf16.msra.mxu0 %v3700_v8  ;;  %2966 = vmatpush1.bf16.msra.mxu1 %v3704_v38 }
 0x67a   :  { %2936 = vmatprep.subr.bf16.mxu0 %v3706_v47  ;;  %2968 = vmatprep.subr.bf16.mxu1 %v3709_v39 }
 0x67d   :  { %2938 = vmatpush1.bf16.msra.mxu0 %v3712_v7  ;;  %2970 = vmatpush1.bf16.msra.mxu1 %v3716_v10 }
 0x732   :  { %v2003_v56 = vpop.f32.mrb[12].mxu0  ;;  %v2074_v2 = vpop.f32.mrb[12].mxu1 }
 0x733   :  { %v2983_v3 = vadd.f32 %v2003_v56, %v3526_v26  ;;  %v2005_v11 = vpop.f32.mrb[13].mxu0  ;;  %v2076_v35 = vpop.f32.mrb[13].mxu1  ;;  %v2999_v17 = vadd.f32 %v2074_v2, %v3535_v51 }
 0x734   :  { %v2984_v54 = vadd.f32 %v2005_v11, %v3528_v28  ;;  %v3000_v1 = vadd.f32 %v2076_v35, %v3532_v44 }
 0x735   :  { %v2437_v31 = vmul.f32 -1.442695, %v2983_v3 }
 0x736   :  { %v2438_v30 = vmul.f32 -1.442695, %v2984_v54  ;;  %v2439_v14 = vmul.f32 -1.442695, %v3000_v1 }
 0x737   :  { %3140 = vpow2.f32 %v2437_v31 }
 0x738   :  { %3142 = vpow2.f32 %v2438_v30 }
 0x739   :  { %3144 = vpow2.f32 %v2439_v14 }
 0x73a   :  { %3146 = vtanh.f32 %v2999_v17 }
 0x741   :  { %v3141_v27 = vpop.eup %3140 }
 0x742   :  { %v3143_v45 = vpop.eup %3142  ;;  %v2086_v63 = vadd.f32 1.0, %v3141_v27 }
 0x743   :  { %v2092_v5 = vadd.f32 1.0, %v3143_v45  ;;  %v3145_v43 = vpop.eup %3144 }
 0x744   :  { %3148 = vrcp.f32 %v2086_v63  ;;  %v3147_v55 = vpop.eup %3146  ;;  %v2099_v47 = vadd.f32 1.0, %v3145_v43 }
 0x745   :  { %3150 = vrcp.f32 %v2092_v5 }
 0x746   :  { %3152 = vrcp.f32 %v2099_v47 }
 0x74e   :  { %v3149_v59 = vpop.eup %3148 }
 0x74f   :  { %v3151_v8 = vpop.eup %3150  ;;  %v2104_v38 = vmul.f32 %v3149_v59, %v3147_v55 }
 0x750   :  { %v2103_v39 = vmul.f32 %v3151_v8, %v3810_v22  ;;  %v3153_v10 = vpop.eup %3152 }
 0x752   :  { %v2105_v7 = vadd.f32 %v2104_v38, %v2103_v39 }
 0x754   :  { %3154 = vtanh.f32 %v2105_v7 }
 0x75e   :  { %v3155_v40 = vpop.eup %3154 }
 0x75f   :  { %v2107_v49 = vmul.f32 %v3155_v40, %v3153_v10 }
 0x761   :  { %2111 = vst [vmem:[#allocation10 + $0x30] sm:$0xff] %v2107_v49  ;;  %2249 = vmatmul.mubr.f32.vlgmr.msra.gmra.mrb[14].mxu0 %v2107_v49  ;;  %2320 = vmatmul.mubr.f32.vlgmr.msra.gmra.mrb[14].mxu1 %v2107_v49 }
 0x834   :  { %v2250_v53 = vpop.f32.mrb[14].mxu0  ;;  %v2321_v58 = vpop.f32.mrb[14].mxu1 }
 0x835   :  { %v2985_v9 = vadd.f32 %v2250_v53, %v3526_v26  ;;  %v2252_v13 = vpop.f32.mrb[15].mxu0  ;;  %v2323_v12 = vpop.f32.mrb[15].mxu1  ;;  %v3001_v61 = vadd.f32 %v2321_v58, %v3535_v51 }
 0x836   :  { %v2986_v18 = vadd.f32 %v2252_v13, %v3528_v28  ;;  %v3002_v22 = vadd.f32 %v2323_v12, %v3532_v44 }
 0x837   :  { %v2440_v46 = vmul.f32 -1.442695, %v2985_v9 }
 0x838   :  { %v2441_v48 = vmul.f32 -1.442695, %v2986_v18  ;;  %v2442_v52 = vmul.f32 -1.442695, %v3002_v22 }
 0x839   :  { %3156 = vpow2.f32 %v2440_v46 }
 0x83a   :  { %3158 = vpow2.f32 %v2441_v48 }
 0x83b   :  { %3160 = vpow2.f32 %v2442_v52 }
 0x83c   :  { %3162 = vtanh.f32 %v3001_v61 }
 0x843   :  { %v3157_v62 = vpop.eup %3156 }
 0x844   :  { %v3159_v6 = vpop.eup %3158  ;;  %v2333_v15 = vadd.f32 1.0, %v3157_v62 }
 0x845   :  { %v2339_v19 = vadd.f32 1.0, %v3159_v6  ;;  %v3161_v26 = vpop.eup %3160 }
 0x846   :  { %3164 = vrcp.f32 %v2333_v15  ;;  %v3163_v21 = vpop.eup %3162  ;;  %v2346_v57 = vadd.f32 1.0, %v3161_v26 }
 0x847   :  { %3166 = vrcp.f32 %v2339_v19 }
 0x848   :  { %3168 = vrcp.f32 %v2346_v57 }
 0x850   :  { %v3165_v28 = vpop.eup %3164 }
 0x851   :  { %v3167_v50 = vpop.eup %3166  ;;  %v2351_v33 = vmul.f32 %v3165_v28, %v3163_v21 }
 0x852   :  { %v2350_v44 = vmul.f32 %v3167_v50, %v2105_v7 }
 0x854   :  { %v2352_v24 = vadd.f32 %v2351_v33, %v2350_v44 }
 0x856   :  { %3170 = vtanh.f32 %v2352_v24  ;;  %2363 = vst [vmem:[#allocation11] sm:$0xff] %v2352_v24 }
 0x857   :  { %3227 = shalt.err (!%p3224_p6)
}
 0x858   :  { %s3228_s13 = scalar_lea.hbm %s3877_s5, 128 }
 0x859   :  { %p3229_p7 = scmp.ne.s32.totalorder %s3877_s5, %s3228_s13  ;;  %p3232_p8 = scmp.lt.u32.totalorder %s3228_s13, %s3877_s5 }
 0x85b   :  { %p3234_p9 = pnand %p3232_p8, %p3229_p7 }
 0x85d   :  { %3237 = shalt.err (!%p3234_p9)
}
 0x85e   :  { %2385 = dma.vmem_to_hbm [thread:$0]  %s2383_s9, 128, %s3877_s5, [#allocation12]   ;;  %v3169_v51 = vpop.eup %3168 }
 0x85f   :  { %s3274_s18 = smov [#allocation10]  }
 0x860   :  { %s2369_s19 = sshll.u32 %s3274_s18, 4  ;;  %v3171_v42 = vpop.eup %3170  ;;  %s2370_s19 = int_to_ptr.vmem [resolvable:$true] %s2369_s19 }
 0x861   :  { %v2354_v25 = vmul.f32 %v3171_v42, %v3169_v51  ;;  %s3238_s20 = scalar_lea.vmem %s2370_s19, 1024  ;;  %p3243_p11 = scmp.lt.s32.totalorder %s2370_s19, %s2370_s19 }
 0x862   :  { %p3239_p10 = scmp.ne.s32.totalorder %s2370_s19, %s3238_s20  ;;  %p3244_p12 = scmp.lt.s32.totalorder %s3238_s20, %s3238_s20 }
 0x863   :  { %2358 = vst [vmem:[#allocation10 + $0x38] sm:$0xff] %v2354_v25 }
 0x864   :  { %p3245_p13 = por %p3244_p12, %p3243_p11 }
 0x866   :  { %p3246_p0 = pnand %p3245_p13, %p3239_p10 }
 0x868   :  { %3249 = shalt.err (!%p3246_p0)
}
 0x869   :  { %s3250_s23 = scalar_lea.hbm %s3876_s4, 1024 }
 0x86a   :  { %p3251_p1 = scmp.ne.s32.totalorder %s3876_s4, %s3250_s23  ;;  %p3254_p2 = scmp.lt.u32.totalorder %s3250_s23, %s3876_s4 }
 0x86c   :  { %p3256_p3 = pnand %p3254_p2, %p3251_p1 }
 0x86e   :  { %3259 = shalt.err (!%p3256_p3)
}
 0x86f   :  { %s3275_s27 = smov 128   ;;  %s3276_s28 = smov 8  }
 0x870   :  { %2375 = dma.vmem_to_hbm [thread:$0]  %s2370_s19, 1024, %s3876_s4, [#allocation7], %s3275_s27, %s3275_s27, %s3276_s28  }
 0x871   :  { %3264 = dma.done.wait [#allocation7], 1024  }
 0x872   :  { %3265 = vsyncadd [#allocation7], 4294966272 }
 0x873   :  { %3266 = dma.done.wait [#allocation12], 128  }
 0x874   :  { %3267 = vsyncadd [#allocation12], 4294967168 }
 0x875   :  { %2392 = vsyncpa [#allocation6], 1 }
 0x876   :  { %2393 = vsyncpa [#allocation9], 1 }
 0x877   :  { %2394 = vsyncpa [#allocation7], 1 }
 0x878   :  { %2395 = vsyncpa [#allocation12], 1 }

</bundles_post_ra>
